<compile_context>
chip_gen: v6e
topology: v6e:2x2x1
jax: 0.10.0
libtpu: 0.0.40
codegen_flags: <defaults>
</compile_context>

<pallas_src>
import math

import jax
import jax.numpy as jnp
from jax.experimental import pallas as pl
from jax.experimental.pallas import tpu as pltpu


# --------------------------------------------------------------------------- #
# Kernels
# --------------------------------------------------------------------------- #
def _lora_qkv_kernel(x_ref, w_ref, b_ref, a_ref, bqv_ref, o_ref):
    """One (tm, C) row-tile of the fused qkv + LoRA projection.

    x_ref   : (tm, C)   input rows in their native dtype (cast in-kernel)
    w_ref   : (C, 3C)   bf16 qkv weight, (in, out) layout
    b_ref   : (1, 3C)   f32  qkv bias
    a_ref   : (C, 2r)   bf16 fused [A_q^T | A_v^T]
    bqv_ref : (2r, 2C)  bf16 block-diagonal: rows [0,r) carry B_q^T into cols
                        [0,C); rows [r,2r) carry B_v^T into cols [C,2C)
    o_ref   : (tm, 3C)  output tile (caller-selected dtype)
    """
    C = w_ref.shape[0]

    # In-kernel VPU cast: avoids a separate wrapper-side cast op + HBM copy.
    x = x_ref[...].astype(w_ref.dtype)

    # Base qkv projection: MXU, f32 accumulation, f32 bias add.
    y = jnp.dot(x, w_ref[...], preferred_element_type=jnp.float32) + b_ref[...]

    # LoRA down-projection: both adapters fused into a single (C, 2r) matmul.
    z = jnp.dot(x, a_ref[...], preferred_element_type=jnp.float32)        # (tm, 2r)

    # LoRA up-projection via the block-diagonal (2r, 2C) slab: d[:, :C] is the
    # q delta, d[:, C:] the v delta.  Output width 2C (not 3C) -> fewer MXU
    # output passes.  (z is rounded to bf16 here; documented extra rounding.)
    d = jnp.dot(z.astype(bqv_ref.dtype), bqv_ref[...],
                preferred_element_type=jnp.float32)                        # (tm, 2C)

    # Three column-block stores; at real SAM dims C and 2C are multiples of
    # 128, so every slice/add/store stays lane-aligned and unmasked.
    o_ref[:, :C]      = (y[:, :C] + d[:, :C]).astype(o_ref.dtype)
    o_ref[:, C:2 * C] = y[:, C:2 * C].astype(o_ref.dtype)
    o_ref[:, 2 * C:]  = (y[:, 2 * C:] + d[:, C:]).astype(o_ref.dtype)


def _qkv_merged_kernel(x_ref, w_ref, b_ref, o_ref):
    """Frozen-LoRA inference path: dW = B@A already merged into w_ref."""
    x = x_ref[...].astype(w_ref.dtype)
    y = jnp.dot(x, w_ref[...], preferred_element_type=jnp.float32) + b_ref[...]
    o_ref[...] = y.astype(o_ref.dtype)


# --------------------------------------------------------------------------- #
# One-time weight preparation
# --------------------------------------------------------------------------- #
def prepare_lora_qkv_params(w_qkv, b_qkv, a_q, b_q, a_v, b_v,
                            compute_dtype=jnp.bfloat16, merge_lora=False):
    """One-time prep: transpose to (in, out), fuse LoRA slabs, cast to bf16.

    Call ONCE at module init (or under one jit so XLA CSEs it) -- not per step.
      w_qkv: (3C, C) nn.Linear(dim, 3*dim) weight      b_qkv: (3C,)
      a_q/a_v: (r, C) LoRA down-proj weights           b_q/b_v: (C, r) up-proj
      merge_lora=True: fold dW = B@A into W_qkv (frozen-LoRA inference) and
      return a_slab = b_slab = None so the kernel skips the LoRA matmuls.
    """
    out3, C = w_qkv.shape
    r = a_q.shape[0]

    w_t = w_qkv.T.astype(jnp.float32)                               # (C, 3C)
    bias = b_qkv.reshape(1, out3).astype(jnp.float32)               # (1, 3C)

    if merge_lora:
        # x @ (W^T + A^T B^T) == qkv(x) + B(A(x)); merge once, LoRA path free.
        w_t = w_t.at[:, :C].add(
            a_q.T.astype(jnp.float32) @ b_q.T.astype(jnp.float32))
        w_t = w_t.at[:, 2 * C:].add(
            a_v.T.astype(jnp.float32) @ b_v.T.astype(jnp.float32))
        return w_t.astype(compute_dtype), bias, None, None

    a_slab = jnp.concatenate([a_q.T, a_v.T], axis=1).astype(compute_dtype)   # (C, 2r)

    # Block-diagonal up-projection slab of width 2C (NOT zero-padded to 3C).
    b_slab = jnp.zeros((2 * r, 2 * C), jnp.float32)
    b_slab = b_slab.at[:r, :C].set(b_q.T.astype(jnp.float32))       # q columns
    b_slab = b_slab.at[r:, C:].set(b_v.T.astype(jnp.float32))       # v columns
    return w_t.astype(compute_dtype), bias, a_slab, b_slab.astype(compute_dtype)


# --------------------------------------------------------------------------- #
# Wrapper
# --------------------------------------------------------------------------- #
def _vmem_capacity_bytes():
    try:
        return int(pltpu.get_tpu_info().vmem_capacity_bytes)
    except Exception:
        return 64 << 20        # conservative fallback: v7x per-core VMEM


def _round_up(x, m):
    return ((x + m - 1) // m) * m


def lora_qkv(x, w_t, bias, a_slab=None, b_slab=None, *, tm=None, out_dtype=None):
    """x: (..., C) -> (..., 3C), matching _LoRA_qkv.forward.

    out_dtype: set to jnp.bfloat16 when downstream accepts it -- halves the
    dominant HBM write stream (largest win on memory-bound v6e configs).
    """
    *lead, C = x.shape
    out3 = w_t.shape[1]
    M = math.prod(lead) if lead else 1
    out_dtype = x.dtype if out_dtype is None else jnp.dtype(out_dtype)
    compute_dtype = w_t.dtype
    use_lora = a_slab is not None

    # No wrapper-side cast or pad: the reshape is free, the dtype cast happens
    # on the VPU inside the kernel, and the row remainder (if any) is handled
    # by Pallas' masked partial last tile instead of a padded HBM copy.
    x2d = x.reshape(M, C)

    vmem_cap = _vmem_capacity_bytes()
    if tm is None:
        # 512 fits the 64 MiB v7x part at SAM dims; 1024 on 128 MiB v5e/v6e.
        tm = 512 if vmem_cap <= (80 << 20) else 1024
    tm = max(8, min(_round_up(tm, 8), _round_up(M, 8)))

    in_b = jnp.dtype(x.dtype).itemsize
    out_b = jnp.dtype(out_dtype).itemsize
    cw_b = jnp.dtype(compute_dtype).itemsize

    def vmem_est(tm_):
        e = (2 * tm_ * C * in_b            # x tiles (double-buffered, native dtype)
             + 2 * tm_ * out3 * out_b      # out tiles (double-buffered)
             + tm_ * C * cw_b              # in-kernel bf16 copy of the x tile
             + 2 * tm_ * out3 * 4          # f32 intermediates (y and LoRA delta)
             + C * out3 * cw_b             # qkv weight (single-buffered)
             + out3 * 4)                   # bias
        if use_lora:
            e += (C * a_slab.shape[1]
                  + b_slab.shape[0] * b_slab.shape[1]) * cw_b
        return e

    cap = vmem_cap * 3 // 4                # headroom below physical VMEM
    while tm > 256 and vmem_est(tm) > cap:
        tm //= 2
    tm = max(8, min(tm, _round_up(M, 8)))

    grid = (pl.cdiv(M, tm),)
    vmem_limit = int(min(max(vmem_est(tm) * 5 // 4, 16 << 20), cap))

    # Grid-invariant blocks never change -> single-buffered.
    once = dict(pipeline_mode=pl.Buffered(1))

    if use_lora:
        kernel = _lora_qkv_kernel
        operands = (x2d, w_t, bias, a_slab, b_slab)
        in_specs = [
            pl.BlockSpec((tm, C), lambda i: (i, 0)),                         # x rows
            pl.BlockSpec((C, out3), lambda i: (0, 0), **once),               # W^T
            pl.BlockSpec((1, out3), lambda i: (0, 0), **once),               # bias
            pl.BlockSpec((C, a_slab.shape[1]), lambda i: (0, 0), **once),    # [Aq|Av]^T
            pl.BlockSpec(b_slab.shape, lambda i: (0, 0), **once),            # blockdiag B
        ]
    else:
        kernel = _qkv_merged_kernel
        operands = (x2d, w_t, bias)
        in_specs = [
            pl.BlockSpec((tm, C), lambda i: (i, 0)),
            pl.BlockSpec((C, out3), lambda i: (0, 0), **once),
            pl.BlockSpec((1, out3), lambda i: (0, 0), **once),
        ]

    out = pl.pallas_call(
        kernel,
        out_shape=jax.ShapeDtypeStruct((M, out3), out_dtype),
        grid_spec=pltpu.PrefetchScalarGridSpec(
            num_scalar_prefetch=0,
            grid=grid,
            in_specs=in_specs,
            out_specs=pl.BlockSpec((tm, out3), lambda i: (i, 0)),
        ),
        compiler_params=pltpu.CompilerParams(
            dimension_semantics=("parallel",),    # M-tiles shard across v7x's 2 TCs
            vmem_limit_bytes=vmem_limit),
    )(*operands)

    return out.reshape(*lead, out3)


def lora_qkv_forward(x, w_qkv, b_qkv, a_q, b_q, a_v, b_v, *,
                     tm=None, out_dtype=None, merge_lora=False):
    """Convenience end-to-end call.  NOTE: rebuilds the fused weight slabs on
    every call; for real use hoist prepare_lora_qkv_params() to module init
    (or keep the whole forward under one jit so the prep is CSE'd)."""
    params = prepare_lora_qkv_params(w_qkv, b_qkv, a_q, b_q, a_v, b_v,
                                     merge_lora=merge_lora)
    return lora_qkv(x, *params, tm=tm, out_dtype=out_dtype)


def lora_qkv_reference(x, w_qkv, b_qkv, a_q, b_q, a_v, b_v):
    """Plain-JAX reference mirroring the PyTorch forward exactly."""
    C = x.shape[-1]
    qkv = jnp.einsum("bhwc,oc->bhwo", x, w_qkv) + b_qkv
    new_q = jnp.einsum("bhwr,or->bhwo", jnp.einsum("bhwc,rc->bhwr", x, a_q), b_q)
    new_v = jnp.einsum("bhwr,or->bhwo", jnp.einsum("bhwc,rc->bhwr", x, a_v), b_v)
    qkv = qkv.at[..., :C].add(new_q)
    qkv = qkv.at[..., -C:].add(new_v)
    return qkv


if __name__ == "__main__":
    # Small SAM-like demo shapes: batch=2, 16x16 tokens, dim=32, LoRA rank=4.
    # Correctness only -- do not tune/benchmark at these dims.
    B, H, W, C, r = 2, 16, 16, 32, 4

    key = jax.random.PRNGKey(0)
    kx, kw, kb, kaq, kbq, kav, kbv = jax.random.split(key, 7)

    x = jax.random.normal(kx, (B, H, W, C), jnp.float32)

    # nn.Linear(dim, 3*dim, bias=True) -> weight (3C, C), bias (3C,)
    w_qkv = jax.random.normal(kw, (3 * C, C), jnp.float32) * 0.05
    b_qkv = jax.random.normal(kb, (3 * C,), jnp.float32) * 0.05
    # LoRA linears (bias-free): A: (r, C), B: (C, r).
    a_q = jax.random.normal(kaq, (r, C), jnp.float32) * 0.05
    b_q = jax.random.normal(kbq, (C, r), jnp.float32) * 0.05
    a_v = jax.random.normal(kav, (r, C), jnp.float32) * 0.05
    b_v = jax.random.normal(kbv, (C, r), jnp.float32) * 0.05

    # Weight prep hoisted out of the forward call (one-time cost).
    params = prepare_lora_qkv_params(w_qkv, b_qkv, a_q, b_q, a_v, b_v)
    out = jax.block_until_ready(lora_qkv(x, *params))

    # Reference from the same bf16-rounded operands the kernel consumes
    # (kernel accumulates in f32), so the comparison isolates the kernel math.
    bf = lambda t: t.astype(jnp.bfloat16).astype(jnp.float32)
    ref = lora_qkv_reference(bf(x), bf(w_qkv), b_qkv,
                             bf(a_q), bf(b_q), bf(a_v), bf(b_v))

    assert out.shape == (B, H, W, 3 * C)
    max_err = float(jnp.max(jnp.abs(out - ref)))
    assert jnp.allclose(out, ref, atol=1e-2, rtol=1e-2), max_err

    # Frozen-LoRA inference path: dW = B@A merged into W_qkv, LoRA matmuls skipped.
    merged = prepare_lora_qkv_params(w_qkv, b_qkv, a_q, b_q, a_v, b_v,
                                     merge_lora=True)
    out_m = jax.block_until_ready(lora_qkv(x, *merged))
    max_err_m = float(jnp.max(jnp.abs(out_m - ref)))
    assert out_m.shape == (B, H, W, 3 * C)
    assert jnp.allclose(out_m, ref, atol=2e-2, rtol=2e-2), max_err_m

    print("KERNEL_OK")
</pallas_src>

<mosaic_0001>
module attributes {stable_mosaic.version = 11 : i64} {
  func.func @_lora_qkv_kernel(%arg0: i32, %arg1: memref<512x32xf32, #tpu.memory_space<vmem>>, %arg2: memref<32x96xbf16, #tpu.memory_space<vmem>>, %arg3: memref<1x96xf32, #tpu.memory_space<vmem>>, %arg4: memref<32x8xbf16, #tpu.memory_space<vmem>>, %arg5: memref<8x64xbf16, #tpu.memory_space<vmem>>, %arg6: memref<512x96xf32, #tpu.memory_space<vmem>>) attributes {dimension_semantics = [#tpu.dimension_semantics<parallel>], iteration_bounds = array<i64: 1>, scalar_prefetch = 0 : i64, scratch_operands = 0 : i64, tpu.core_type = #tpu.core_type<tc>, window_params = [{transform_indices = @transform_0, window_bounds = array<i64: 512, 32>}, {pipeline_mode = #tpu.pipeline_mode<synchronous>, transform_indices = @transform_1, window_bounds = array<i64: 32, 96>}, {pipeline_mode = #tpu.pipeline_mode<synchronous>, transform_indices = @transform_2, window_bounds = array<i64: 1, 96>}, {pipeline_mode = #tpu.pipeline_mode<synchronous>, transform_indices = @transform_3, window_bounds = array<i64: 32, 8>}, {pipeline_mode = #tpu.pipeline_mode<synchronous>, transform_indices = @transform_4, window_bounds = array<i64: 8, 64>}, {transform_indices = @transform_5, window_bounds = array<i64: 512, 96>}]} {
    %c0 = arith.constant 0 : index
    %c0_0 = arith.constant 0 : index
    %0 = vector.load %arg1[%c0, %c0_0] : memref<512x32xf32, #tpu.memory_space<vmem>>, vector<512x32xf32>
    %1 = arith.truncf %0 : vector<512x32xf32> to vector<512x32xbf16>
    %c0_1 = arith.constant 0 : index
    %c0_2 = arith.constant 0 : index
    %2 = vector.load %arg2[%c0_1, %c0_2] : memref<32x96xbf16, #tpu.memory_space<vmem>>, vector<32x96xbf16>
    %cst = arith.constant dense<0.000000e+00> : vector<512x96xf32>
    %3 = tpu.matmul %1, %2, %cst {dimension_numbers = #tpu.dot_dimension_numbers<[1], [0], [0], [1], [0, 0, 1, 1], [], []>} : vector<512x32xbf16>, vector<32x96xbf16>, vector<512x96xf32> -> vector<512x96xf32>
    %c0_3 = arith.constant 0 : index
    %c0_4 = arith.constant 0 : index
    %4 = vector.load %arg3[%c0_3, %c0_4] : memref<1x96xf32, #tpu.memory_space<vmem>>, vector<1x96xf32>
    %5 = vector.broadcast %4 : vector<1x96xf32> to vector<512x96xf32>
    %6 = arith.addf %3, %5 : vector<512x96xf32>
    %c0_5 = arith.constant 0 : index
    %c0_6 = arith.constant 0 : index
    %7 = vector.load %arg4[%c0_5, %c0_6] : memref<32x8xbf16, #tpu.memory_space<vmem>>, vector<32x8xbf16>
    %cst_7 = arith.constant dense<0.000000e+00> : vector<512x8xf32>
    %8 = tpu.matmul %1, %7, %cst_7 {dimension_numbers = #tpu.dot_dimension_numbers<[1], [0], [0], [1], [0, 0, 1, 1], [], []>} : vector<512x32xbf16>, vector<32x8xbf16>, vector<512x8xf32> -> vector<512x8xf32>
    %9 = arith.truncf %8 : vector<512x8xf32> to vector<512x8xbf16>
    %c0_8 = arith.constant 0 : index
    %c0_9 = arith.constant 0 : index
    %10 = vector.load %arg5[%c0_8, %c0_9] : memref<8x64xbf16, #tpu.memory_space<vmem>>, vector<8x64xbf16>
    %cst_10 = arith.constant dense<0.000000e+00> : vector<512x64xf32>
    %11 = tpu.matmul %9, %10, %cst_10 {dimension_numbers = #tpu.dot_dimension_numbers<[1], [0], [0], [1], [0, 0, 1, 1], [], []>} : vector<512x8xbf16>, vector<8x64xbf16>, vector<512x64xf32> -> vector<512x64xf32>
    %12 = vector.extract_strided_slice %6 {offsets = [0, 0], sizes = [512, 32], strides = [1, 1]} : vector<512x96xf32> to vector<512x32xf32>
    %13 = vector.extract_strided_slice %11 {offsets = [0, 0], sizes = [512, 32], strides = [1, 1]} : vector<512x64xf32> to vector<512x32xf32>
    %14 = arith.addf %12, %13 : vector<512x32xf32>
    %c0_11 = arith.constant 0 : index
    %c0_12 = arith.constant 0 : index
    %15 = vector.load %arg6[%c0_11, %c0_12] : memref<512x96xf32, #tpu.memory_space<vmem>>, vector<512x32xf32>
    tpu.vector_store %arg6[%c0_11, %c0_12], %14 {strides = array<i32>} : memref<512x96xf32, #tpu.memory_space<vmem>>, vector<512x32xf32>,
    %16 = vector.extract_strided_slice %6 {offsets = [0, 32], sizes = [512, 32], strides = [1, 1]} : vector<512x96xf32> to vector<512x32xf32>
    %c0_13 = arith.constant 0 : index
    %c32 = arith.constant 32 : index
    %17 = vector.load %arg6[%c0_13, %c32] : memref<512x96xf32, #tpu.memory_space<vmem>>, vector<512x32xf32>
    tpu.vector_store %arg6[%c0_13, %c32], %16 {strides = array<i32>} : memref<512x96xf32, #tpu.memory_space<vmem>>, vector<512x32xf32>,
    %18 = vector.extract_strided_slice %6 {offsets = [0, 64], sizes = [512, 32], strides = [1, 1]} : vector<512x96xf32> to vector<512x32xf32>
    %19 = vector.extract_strided_slice %11 {offsets = [0, 32], sizes = [512, 32], strides = [1, 1]} : vector<512x64xf32> to vector<512x32xf32>
    %20 = arith.addf %18, %19 : vector<512x32xf32>
    %c0_14 = arith.constant 0 : index
    %c64 = arith.constant 64 : index
    %21 = vector.load %arg6[%c0_14, %c64] : memref<512x96xf32, #tpu.memory_space<vmem>>, vector<512x32xf32>
    tpu.vector_store %arg6[%c0_14, %c64], %20 {strides = array<i32>} : memref<512x96xf32, #tpu.memory_space<vmem>>, vector<512x32xf32>,
    return
  }
  func.func @transform_0(%arg0: i32) -> (i32, i32) {
    %c0_i32 = arith.constant 0 : i32
    %c0_i32_0 = arith.constant 0 : i32
    return %arg0, %c0_i32 : i32, i32
  }
  func.func @transform_1(%arg0: i32) -> (i32, i32) {
    %c0_i32 = arith.constant 0 : i32
    %c0_i32_0 = arith.constant 0 : i32
    %c0_i32_1 = arith.constant 0 : i32
    return %c0_i32, %c0_i32_0 : i32, i32
  }
  func.func @transform_2(%arg0: i32) -> (i32, i32) {
    %c0_i32 = arith.constant 0 : i32
    %c0_i32_0 = arith.constant 0 : i32
    %c0_i32_1 = arith.constant 0 : i32
    return %c0_i32, %c0_i32_0 : i32, i32
  }
  func.func @transform_3(%arg0: i32) -> (i32, i32) {
    %c0_i32 = arith.constant 0 : i32
    %c0_i32_0 = arith.constant 0 : i32
    %c0_i32_1 = arith.constant 0 : i32
    return %c0_i32, %c0_i32_0 : i32, i32
  }
  func.func @transform_4(%arg0: i32) -> (i32, i32) {
    %c0_i32 = arith.constant 0 : i32
    %c0_i32_0 = arith.constant 0 : i32
    %c0_i32_1 = arith.constant 0 : i32
    return %c0_i32, %c0_i32_0 : i32, i32
  }
  func.func @transform_5(%arg0: i32) -> (i32, i32) {
    %c0_i32 = arith.constant 0 : i32
    %c0_i32_0 = arith.constant 0 : i32
    return %arg0, %c0_i32 : i32, i32
  }
}

</mosaic_0001>

<bundles_post_ra>
// kernel: tpu_custom_call.1
= control target key start
LH: loop header
LB: loop body
LE: loop exit
PB: predicated region body
PF: predicated region fallthrough
CT: control target
= control target key end

     0   :  { %vm140_vm0 = vcmask 261120   ;;  %vm961_vm1 = vcmask 1043456   ;;  %vm864_vm2 = vcmask 64512   ;;  %vm1382_vm3 = vcmask 523520   ;;  %s2250_s21 = smov 32   ;;  %s4089_s1 = inlined_call_operand.vmem [shape: bf16[32,96], index: 1, kind: input, shape index: {}]   ;;  %s4090_s0 = inlined_call_operand.vmem [shape: f32[512,32], index: 0, kind: input, shape index: {}]   ;;  %s4091_s3 = inlined_call_operand.vmem [shape: bf16[32,8], index: 3, kind: input, shape index: {}]   ;;  %s4092_s4 = inlined_call_operand.vmem [shape: bf16[8,64], index: 4, kind: input, shape index: {}]   ;;  %s4093_s2 = inlined_call_operand.vmem [shape: f32[1,96], index: 2, kind: input, shape index: {}]   ;;  %s4094_s5 = inlined_call_operand.vmem [shape: f32[512,96], index: 5, kind: output, shape index: {}]  }
   0x1   :  { %v2246_v0 = vld [vmem:[%s4089_s1 + $0x8] sm:$0xff]   ;;  %v2247_v1 = vld [vmem:[%s4089_s1] sm:$0xff]   ;;  %v55_v4 = vld [vmem:[%s4090_s0 + $0x110] sm:$0xff]  ;;  %vm1767_vm4 = vcmask 785920  }
   0x2   :  { %2240 = vmatprep.subr.bf16.mxu1 %v2246_v0  ;;  %v53_v2 = vld [vmem:[%s4090_s0 + $0x100] sm:$0xff]  ;;  %v54_v3 = vld [vmem:[%s4090_s0 + $0x108] sm:$0xff]  ;;  %2038 = vmatprep.subr.bf16.mxu0 %v2246_v0  ;;  %v56_v6 = vld [vmem:[%s4090_s0 + $0x118] sm:$0xff] }
   0x3   :  { %2242 = vmatpush3.bf16.msra.mxu1 %v2246_v0  ;;  %v2296_v5 = vpack.c.bf16 %v54_v3, %v53_v2  ;;  %2039 = vmatpush3.bf16.msra.mxu0 %v2246_v0  ;;  %v2248_v7 = vld [vmem:[%s4091_s3 + $0x8] sm:$0xff]   ;;  %v57_v8 = vld [vmem:[%s4090_s0 + $0x120] sm:$0xff]  ;;  %v2312_v10 = vpack.c.bf16 %v56_v6, %v55_v4  ;;  %v59_v13 = vld [vmem:[%s4090_s0 + $0x130] sm:$0xff] }
   0x4   :  { %2241 = vmatprep.subr.bf16.mxu1 %v2247_v1  ;;  %v58_v9 = vld [vmem:[%s4090_s0 + $0x128] sm:$0xff]  ;;  %2040 = vmatprep.subr.bf16.mxu0 %v2247_v1  ;;  %v2249_v12 = vld [vmem:[%s4091_s3] sm:$0xff]   ;;  %v60_v14 = vld [vmem:[%s4090_s0 + $0x138] sm:$0xff] }
   0x5   :  { %2074 = vmatprep.mubr.msk.bf16.mxu1 %vm140_vm0, %v2296_v5  ;;  %v2314_v11 = vpack.c.bf16 %v58_v9, %v57_v8  ;;  %v61_v15 = vld [vmem:[%s4090_s0 + $0x140] sm:$0xff]  ;;  %v62_v16 = vld [vmem:[%s4090_s0 + $0x148] sm:$0xff]  ;;  %v2335_v17 = vpack.c.bf16 %v60_v14, %v59_v13  ;;  %v23_v21 = vld [vmem:[%s4090_s0 + $0x10] sm:$0xff] }
   0x6   :  { %v21_v18 = vld [vmem:[%s4090_s0] sm:$0xff]  ;;  %v2340_v19 = vpack.c.bf16 %v62_v16, %v61_v15  ;;  %v22_v20 = vld [vmem:[%s4090_s0 + $0x8] sm:$0xff]  ;;  %v24_v22 = vld [vmem:[%s4090_s0 + $0x18] sm:$0xff] }
   0x7   :  { %2243 = vmatpush3.bf16.msra.mxu1 %v2247_v1  ;;  %2041 = vmatpush3.bf16.msra.mxu0 %v2247_v1  ;;  %v2351_v23 = vpack.c.bf16 %v22_v20, %v21_v18  ;;  %v25_v24 = vld [vmem:[%s4090_s0 + $0x20] sm:$0xff]  ;;  %v26_v25 = vld [vmem:[%s4090_s0 + $0x28] sm:$0xff]  ;;  %v2359_v26 = vpack.c.bf16 %v24_v22, %v23_v21  ;;  %v63_v28 = vld [vmem:[%s4090_s0 + $0x150] sm:$0xff] }
   0x8   :  { %2106 = vmatprep.subr.bf16.mxu1 %v2248_v7  ;;  %v2363_v27 = vpack.c.bf16 %v26_v25, %v25_v24  ;;  %v64_v29 = vld [vmem:[%s4090_s0 + $0x158] sm:$0xff]  ;;  %v65_v30 = vld [vmem:[%s4090_s0 + $0x160] sm:$0xff]  ;;  %v66_v31 = vld [vmem:[%s4090_s0 + $0x168] sm:$0xff] }
   0x9   :  { %2042 = vmatprep.mubr.msk.bf16.mxu0 %vm140_vm0, %v2351_v23  ;;  %v2385_v32 = vpack.c.bf16 %v64_v29, %v63_v28  ;;  %v27_v33 = vld [vmem:[%s4090_s0 + $0x30] sm:$0xff]  ;;  %v28_v34 = vld [vmem:[%s4090_s0 + $0x38] sm:$0xff]  ;;  %v2393_v35 = vpack.c.bf16 %v66_v31, %v65_v30  ;;  %v29_v36 = vld [vmem:[%s4090_s0 + $0x40] sm:$0xff] }
   0xa   :  { %2075 = vmatmul.mubr.msk.bf16.vlgmr.msra.gmra.mxu1 %vm140_vm0, %v2312_v10  ;;  %2043 = vmatmul.mubr.msk.bf16.vlgmr.msra.gmra.mxu0 %vm140_vm0, %v2359_v26  ;;  %v30_v37 = vld [vmem:[%s4090_s0 + $0x48] sm:$0xff]  ;;  %v2401_v38 = vpack.c.bf16 %v28_v34, %v27_v33  ;;  %v67_v40 = vld [vmem:[%s4090_s0 + $0x170] sm:$0xff]  ;;  %v68_v41 = vld [vmem:[%s4090_s0 + $0x178] sm:$0xff] }
   0xb   :  { %2107 = vmatpush3.bf16.msra.mxu1 %v2248_v7  ;;  %2078 = vmatprep.mubr.msk.bf16.mxu1 %vm140_vm0, %v2314_v11  ;;  %v2405_v39 = vpack.c.bf16 %v30_v37, %v29_v36  ;;  %v69_v42 = vld [vmem:[%s4090_s0 + $0x180] sm:$0xff]  ;;  %v70_v43 = vld [vmem:[%s4090_s0 + $0x188] sm:$0xff]  ;;  %v2425_v44 = vpack.c.bf16 %v68_v41, %v67_v40  ;;  %v31_v45 = vld [vmem:[%s4090_s0 + $0x50] sm:$0xff] }
   0xc   :  { %2108 = vmatprep.subr.bf16.mxu1 %v2249_v12  ;;  %2046 = vmatprep.mubr.msk.bf16.mxu0 %vm140_vm0, %v2363_v27  ;;  %v32_v46 = vld [vmem:[%s4090_s0 + $0x58] sm:$0xff]  ;;  %v2433_v47 = vpack.c.bf16 %v70_v43, %v69_v42  ;;  %v33_v48 = vld [vmem:[%s4090_s0 + $0x60] sm:$0xff]  ;;  %v34_v49 = vld [vmem:[%s4090_s0 + $0x68] sm:$0xff] }
   0xd   :  { %v2441_v50 = vpack.c.bf16 %v32_v46, %v31_v45  ;;  %v2445_v51 = vpack.c.bf16 %v34_v49, %v33_v48  ;;  %v71_v52 = vld [vmem:[%s4090_s0 + $0x190] sm:$0xff]  ;;  %v72_v53 = vld [vmem:[%s4090_s0 + $0x198] sm:$0xff]  ;;  %v73_v54 = vld [vmem:[%s4090_s0 + $0x1a0] sm:$0xff] }
   0xe   :  { %v74_v55 = vld [vmem:[%s4090_s0 + $0x1a8] sm:$0xff]  ;;  %v2465_v56 = vpack.c.bf16 %v72_v53, %v71_v52  ;;  %v35_v57 = vld [vmem:[%s4090_s0 + $0x70] sm:$0xff]  ;;  %v36_v58 = vld [vmem:[%s4090_s0 + $0x78] sm:$0xff] }
   0xf   :  { %2109 = vmatpush3.bf16.msra.mxu1 %v2249_v12  ;;  %v2473_v59 = vpack.c.bf16 %v74_v55, %v73_v54  ;;  %v37_v60 = vld [vmem:[%s4090_s0 + $0x80] sm:$0xff]  ;;  %v38_v61 = vld [vmem:[%s4090_s0 + $0x88] sm:$0xff]  ;;  %v2481_v62 = vpack.c.bf16 %v36_v58, %v35_v57  ;;  %v75_v0 = vld [vmem:[%s4090_s0 + $0x1b0] sm:$0xff] }
  0x10   :  { %v2485_v63 = vpack.c.bf16 %v38_v61, %v37_v60  ;;  %v76_v1 = vld [vmem:[%s4090_s0 + $0x1b8] sm:$0xff]  ;;  %v77_v2 = vld [vmem:[%s4090_s0 + $0x1c0] sm:$0xff]  ;;  %v78_v3 = vld [vmem:[%s4090_s0 + $0x1c8] sm:$0xff] }
  0x11   :  { %v2505_v4 = vpack.c.bf16 %v76_v1, %v75_v0  ;;  %v39_v6 = vld [vmem:[%s4090_s0 + $0x90] sm:$0xff]  ;;  %v40_v7 = vld [vmem:[%s4090_s0 + $0x98] sm:$0xff]  ;;  %v2513_v8 = vpack.c.bf16 %v78_v3, %v77_v2  ;;  %v41_v9 = vld [vmem:[%s4090_s0 + $0xa0] sm:$0xff] }
  0x12   :  { %2079 = vmatmul.mubr.msk.bf16.gmra.mxu1 %vm140_vm0, %v2335_v17  ;;  %2047 = vmatmul.mubr.msk.bf16.gmra.mxu0 %vm140_vm0, %v2401_v38  ;;  %v42_v12 = vld [vmem:[%s4090_s0 + $0xa8] sm:$0xff]  ;;  %v94_v13 = vpack.c.bf16 %v40_v7, %v39_v6  ;;  %v79_v15 = vld [vmem:[%s4090_s0 + $0x1d0] sm:$0xff]  ;;  %v80_v16 = vld [vmem:[%s4090_s0 + $0x1d8] sm:$0xff] }
  0x13   :  { %2082 = vmatprep.mubr.msk.bf16.mxu1 %vm140_vm0, %v2340_v19  ;;  %2050 = vmatprep.mubr.msk.bf16.mxu0 %vm140_vm0, %v2405_v39  ;;  %v95_v14 = vpack.c.bf16 %v42_v12, %v41_v9  ;;  %v81_v18 = vld [vmem:[%s4090_s0 + $0x1e0] sm:$0xff]  ;;  %v82_v20 = vld [vmem:[%s4090_s0 + $0x1e8] sm:$0xff]  ;;  %v2539_v21 = vpack.c.bf16 %v80_v16, %v79_v15  ;;  %v43_v22 = vld [vmem:[%s4090_s0 + $0xb0] sm:$0xff] }
  0x14   :  { %v44_v24 = vld [vmem:[%s4090_s0 + $0xb8] sm:$0xff]  ;;  %v115_v25 = vpack.c.bf16 %v82_v20, %v81_v18  ;;  %v45_v28 = vld [vmem:[%s4090_s0 + $0xc0] sm:$0xff]  ;;  %v46_v29 = vld [vmem:[%s4090_s0 + $0xc8] sm:$0xff] }
  0x15   :  { %v96_v30 = vpack.c.bf16 %v44_v24, %v43_v22  ;;  %v97_v31 = vpack.c.bf16 %v46_v29, %v45_v28  ;;  %v83_v33 = vld [vmem:[%s4090_s0 + $0x1f0] sm:$0xff]  ;;  %v84_v34 = vld [vmem:[%s4090_s0 + $0x1f8] sm:$0xff]  ;;  %v49_v41 = vld [vmem:[%s4090_s0 + $0xe0] sm:$0xff] }
  0x16   :  { %v116_v36 = vpack.c.bf16 %v84_v34, %v83_v33  ;;  %v47_v37 = vld [vmem:[%s4090_s0 + $0xd0] sm:$0xff]  ;;  %v48_v40 = vld [vmem:[%s4090_s0 + $0xd8] sm:$0xff]  ;;  %v50_v42 = vld [vmem:[%s4090_s0 + $0xe8] sm:$0xff] }
  0x17   :  { %v98_v43 = vpack.c.bf16 %v48_v40, %v47_v37  ;;  %v99_v45 = vpack.c.bf16 %v50_v42, %v49_v41  ;;  %v51_v46 = vld [vmem:[%s4090_s0 + $0xf0] sm:$0xff]  ;;  %v52_v48 = vld [vmem:[%s4090_s0 + $0xf8] sm:$0xff] }
  0x18   :  { %v100_v49 = vpack.c.bf16 %v52_v48, %v51_v46 }
  0x1a   :  { %2083 = vmatmul.mubr.msk.bf16.gmra.mxu1 %vm140_vm0, %v2385_v32  ;;  %2051 = vmatmul.mubr.msk.bf16.gmra.mxu0 %vm140_vm0, %v2441_v50 }
  0x1b   :  { %2086 = vmatprep.mubr.msk.bf16.mxu1 %vm140_vm0, %v2393_v35  ;;  %2054 = vmatprep.mubr.msk.bf16.mxu0 %vm140_vm0, %v2445_v51 }
  0x22   :  { %2087 = vmatmul.mubr.msk.bf16.gmra.mxu1 %vm140_vm0, %v2425_v44  ;;  %2055 = vmatmul.mubr.msk.bf16.gmra.mxu0 %vm140_vm0, %v2481_v62 }
  0x23   :  { %2090 = vmatprep.mubr.msk.bf16.mxu1 %vm140_vm0, %v2433_v47  ;;  %2058 = vmatprep.mubr.msk.bf16.mxu0 %vm140_vm0, %v2485_v63 }
  0x2a   :  { %2091 = vmatmul.mubr.msk.bf16.gmra.mxu1 %vm140_vm0, %v2465_v56  ;;  %2059 = vmatmul.mubr.msk.bf16.gmra.mxu0 %vm140_vm0, %v94_v13 }
  0x2b   :  { %2094 = vmatprep.mubr.msk.bf16.mxu1 %vm140_vm0, %v2473_v59  ;;  %2062 = vmatprep.mubr.msk.bf16.mxu0 %vm140_vm0, %v95_v14 }
  0x32   :  { %2095 = vmatmul.mubr.msk.bf16.gmra.mxu1 %vm140_vm0, %v2505_v4  ;;  %2063 = vmatmul.mubr.msk.bf16.gmra.mxu0 %vm140_vm0, %v96_v30 }
  0x33   :  { %2098 = vmatprep.mubr.msk.bf16.mxu1 %vm140_vm0, %v2513_v8  ;;  %2066 = vmatprep.mubr.msk.bf16.mxu0 %vm140_vm0, %v97_v31 }
  0x3a   :  { %2099 = vmatmul.mubr.msk.bf16.gmra.mxu1 %vm140_vm0, %v2539_v21  ;;  %2067 = vmatmul.mubr.msk.bf16.gmra.mxu0 %vm140_vm0, %v98_v43 }
  0x3b   :  { %2102 = vmatprep.mubr.msk.bf16.mxu1 %vm140_vm0, %v115_v25  ;;  %2070 = vmatprep.mubr.msk.bf16.mxu0 %vm140_vm0, %v99_v45 }
  0x42   :  { %2103 = vmatmul.mubr.msk.bf16.gmra.mxu1 %vm140_vm0, %v116_v36  ;;  %2071 = vmatmul.mubr.msk.bf16.gmra.mxu0 %vm140_vm0, %v100_v49 }
  0x43   :  { %2110 = vmatprep.mubr.msk.bf16.mxu1 %vm140_vm0, %v2351_v23  ;;  %v863_v23 = vld [vmem:[%s4092_s4] sm:$0xf] }
  0x44   :  { %2244 = vmatprep.subr.msk.bf16.mxu0 %vm961_vm1, %v863_v23  ;;  %v963_v52 = vsel %vm961_vm1, %v863_v23, 0 }
  0x45   :  { %2175 = vmatpush3.bf16.msra.mxu0 %v963_v52 }
  0x4a   :  { %2111 = vmatmul.mubr.msk.bf16.vlgmr.msra.gmra.mxu1 %vm140_vm0, %v2359_v26 }
  0x4b   :  { %2114 = vmatprep.mubr.msk.bf16.mxu1 %vm140_vm0, %v2363_v27 }
  0x52   :  { %2115 = vmatmul.mubr.msk.bf16.gmra.mxu1 %vm140_vm0, %v2401_v38 }
  0x53   :  { %2118 = vmatprep.mubr.msk.bf16.mxu1 %vm140_vm0, %v2405_v39 }
  0x5a   :  { %2119 = vmatmul.mubr.msk.bf16.gmra.mxu1 %vm140_vm0, %v2441_v50 }
  0x5b   :  { %2122 = vmatprep.mubr.msk.bf16.mxu1 %vm140_vm0, %v2445_v51 }
  0x62   :  { %2123 = vmatmul.mubr.msk.bf16.gmra.mxu1 %vm140_vm0, %v2481_v62 }
  0x63   :  { %2126 = vmatprep.mubr.msk.bf16.mxu1 %vm140_vm0, %v2485_v63 }
  0x6a   :  { %2127 = vmatmul.mubr.msk.bf16.gmra.mxu1 %vm140_vm0, %v94_v13 }
  0x6b   :  { %2130 = vmatprep.mubr.msk.bf16.mxu1 %vm140_vm0, %v95_v14 }
  0x72   :  { %2131 = vmatmul.mubr.msk.bf16.gmra.mxu1 %vm140_vm0, %v96_v30 }
  0x73   :  { %2134 = vmatprep.mubr.msk.bf16.mxu1 %vm140_vm0, %v97_v31 }
  0x7a   :  { %2135 = vmatmul.mubr.msk.bf16.gmra.mxu1 %vm140_vm0, %v98_v43 }
  0x7b   :  { %2138 = vmatprep.mubr.msk.bf16.mxu1 %vm140_vm0, %v99_v45 }
  0x82   :  { %2139 = vmatmul.mubr.msk.bf16.gmra.mxu1 %vm140_vm0, %v100_v49 }
  0x83   :  { %2142 = vmatprep.mubr.msk.bf16.mxu1 %vm140_vm0, %v2296_v5 }
  0x8a   :  { %2143 = vmatmul.mubr.msk.bf16.gmra.mxu1 %vm140_vm0, %v2312_v10 }
  0x8b   :  { %2146 = vmatprep.mubr.msk.bf16.mxu1 %vm140_vm0, %v2314_v11 }
  0x92   :  { %2147 = vmatmul.mubr.msk.bf16.gmra.mxu1 %vm140_vm0, %v2335_v17 }
  0x93   :  { %2150 = vmatprep.mubr.msk.bf16.mxu1 %vm140_vm0, %v2340_v19 }
  0x9a   :  { %2151 = vmatmul.mubr.msk.bf16.gmra.mxu1 %vm140_vm0, %v2385_v32 }
  0x9b   :  { %2154 = vmatprep.mubr.msk.bf16.mxu1 %vm140_vm0, %v2393_v35 }
  0xa2   :  { %2155 = vmatmul.mubr.msk.bf16.gmra.mxu1 %vm140_vm0, %v2425_v44 }
  0xa3   :  { %2158 = vmatprep.mubr.msk.bf16.mxu1 %vm140_vm0, %v2433_v47 }
  0xaa   :  { %2159 = vmatmul.mubr.msk.bf16.gmra.mxu1 %vm140_vm0, %v2465_v56 }
  0xab   :  { %2162 = vmatprep.mubr.msk.bf16.mxu1 %vm140_vm0, %v2473_v59 }
  0xb2   :  { %2163 = vmatmul.mubr.msk.bf16.gmra.mxu1 %vm140_vm0, %v2505_v4 }
  0xb3   :  { %2166 = vmatprep.mubr.msk.bf16.mxu1 %vm140_vm0, %v2513_v8 }
  0xba   :  { %2167 = vmatmul.mubr.msk.bf16.gmra.mxu1 %vm140_vm0, %v2539_v21 }
  0xbb   :  { %2170 = vmatprep.mubr.msk.bf16.mxu1 %vm140_vm0, %v115_v25 }
  0xc2   :  { %2171 = vmatmul.mubr.msk.bf16.gmra.mxu1 %vm140_vm0, %v116_v36 }
  0xca   :  { %v2644_v5 = vpop.f32.mrf.mxu1 }
  0xcc   :  { %v2646_v10 = vpop.f32.mrf.mxu1 }
  0xce   :  { %v2648_v11 = vpop.f32.mrf.mxu1 }
  0xd0   :  { %v2650_v17 = vpop.f32.mrf.mxu1 }
  0xd2   :  { %v2652_v19 = vpop.f32.mrf.mxu1 }
  0xd4   :  { %v2654_v26 = vpop.f32.mrf.mxu1 }
  0xd6   :  { %v2656_v27 = vpop.f32.mrf.mxu1 }
  0xd8   :  { %v2658_v32 = vpop.f32.mrf.mxu1 }
  0xda   :  { %v2660_v35 = vpop.f32.mrf.mxu1 }
  0xdc   :  { %v2662_v38 = vpop.f32.mrf.mxu1 }
  0xde   :  { %v2664_v39 = vpop.f32.mrf.mxu1 }
  0xe0   :  { %v2666_v44 = vpop.f32.mrf.mxu1 }
  0xe2   :  { %v2668_v47 = vpop.f32.mrf.mxu1 }
  0xe4   :  { %v2670_v50 = vpop.f32.mrf.mxu1 }
  0xe6   :  { %v2672_v51 = vpop.f32.mrf.mxu1 }
  0xe8   :  { %v2674_v53 = vpop.f32.mrf.mxu1 }
  0xea   :  { %v2676_v54 = vpop.f32.mrf.mxu1 }
  0xec   :  { %v2678_v55 = vpop.f32.mrf.mxu1 }
  0xee   :  { %v2680_v56 = vpop.f32.mrf.mxu1 }
  0xf0   :  { %v2682_v57 = vpop.f32.mrf.mxu1 }
  0xf2   :  { %v2684_v58 = vpop.f32.mrf.mxu1 }
  0xf4   :  { %v2686_v59 = vpop.f32.mrf.mxu1 }
  0xf6   :  { %v2688_v60 = vpop.f32.mrf.mxu1 }
  0xf8   :  { %v2690_v61 = vpop.f32.mrf.mxu1 }
  0xfa   :  { %v2692_v62 = vpop.f32.mrf.mxu1 }
  0xfc   :  { %v2694_v63 = vpop.f32.mrf.mxu1 }
  0xfd   :  { %4101 = vst [vmem:[#allocation2_spill] sm:$0xff] %v2694_v63 }
  0xfe   :  { %v2696_v0 = vpop.f32.mrf.mxu1 }
  0xff   :  { %4102 = vst [vmem:[#allocation3_spill] sm:$0xff] %v2696_v0 }
 0x100   :  { %v2698_v1 = vpop.f32.mrf.mxu1 }
 0x101   :  { %4103 = vst [vmem:[#allocation4_spill] sm:$0xff] %v2698_v1 }
 0x102   :  { %v2700_v2 = vpop.f32.mrf.mxu1 }
 0x103   :  { %4104 = vst [vmem:[#allocation5_spill] sm:$0xff] %v2700_v2 }
 0x104   :  { %v2702_v3 = vpop.f32.mrf.mxu1 }
 0x105   :  { %4105 = vst [vmem:[#allocation6_spill] sm:$0xff] %v2702_v3 }
 0x106   :  { %v2704_v4 = vpop.f32.mrf.mxu1 }
 0x107   :  { %4106 = vst [vmem:[#allocation7_spill] sm:$0xff] %v2704_v4 }
 0x108   :  { %v2706_v6 = vpop.f32.mrf.mxu1 }
 0x109   :  { %4107 = vst [vmem:[#allocation8_spill] sm:$0xff] %v2706_v6 }
 0x10a   :  { %v2112_v7 = vpop.f32.mrf.mxu1 }
 0x10c   :  { %v576_v8 = vpop.f32.mrf.mxu1 }
 0x10e   :  { %v2113_v9 = vpop.f32.mrf.mxu1 }
 0x10f   :  { %v832_v14 = vpack.c.bf16 %v2113_v9, %v2112_v7 }
 0x110   :  { %v579_v12 = vpop.f32.mrf.mxu1 }
 0x111   :  { %v831_v13 = vpack.c.bf16 %v579_v12, %v576_v8 }
 0x112   :  { %v2116_v15 = vpop.f32.mrf.mxu1 }
 0x113   :  { %2176 = vmatprep.mubr.msk.bf16.mxu0 %vm864_vm2, %v831_v13 }
 0x114   :  { %v592_v16 = vpop.f32.mrf.mxu1  ;;  %2177 = vmatmul.mubr.msk.bf16.vlgmr.msra.gmra.mxu0 %vm864_vm2, %v832_v14 }
 0x116   :  { %v2117_v18 = vpop.f32.mrf.mxu1 }
 0x117   :  { %v834_v22 = vpack.c.bf16 %v2117_v18, %v2116_v15 }
 0x118   :  { %v595_v20 = vpop.f32.mrf.mxu1 }
 0x119   :  { %v833_v21 = vpack.c.bf16 %v595_v20, %v592_v16 }
 0x11a   :  { %v2120_v24 = vpop.f32.mrf.mxu1 }
 0x11b   :  { %2180 = vmatprep.mubr.msk.bf16.mxu0 %vm864_vm2, %v833_v21 }
 0x11c   :  { %v608_v25 = vpop.f32.mrf.mxu1  ;;  %2181 = vmatmul.mubr.msk.bf16.gmra.mxu0 %vm864_vm2, %v834_v22 }
 0x11e   :  { %v2121_v28 = vpop.f32.mrf.mxu1 }
 0x11f   :  { %v836_v31 = vpack.c.bf16 %v2121_v28, %v2120_v24 }
 0x120   :  { %v611_v29 = vpop.f32.mrf.mxu1 }
 0x121   :  { %v835_v30 = vpack.c.bf16 %v611_v29, %v608_v25 }
 0x122   :  { %v2124_v33 = vpop.f32.mrf.mxu1 }
 0x123   :  { %2184 = vmatprep.mubr.msk.bf16.mxu0 %vm864_vm2, %v835_v30 }
 0x124   :  { %v624_v34 = vpop.f32.mrf.mxu1  ;;  %2185 = vmatmul.mubr.msk.bf16.gmra.mxu0 %vm864_vm2, %v836_v31 }
 0x126   :  { %v2125_v36 = vpop.f32.mrf.mxu1 }
 0x127   :  { %v838_v41 = vpack.c.bf16 %v2125_v36, %v2124_v33 }
 0x128   :  { %v627_v37 = vpop.f32.mrf.mxu1 }
 0x129   :  { %v837_v40 = vpack.c.bf16 %v627_v37, %v624_v34 }
 0x12a   :  { %v2128_v42 = vpop.f32.mrf.mxu1 }
 0x12b   :  { %2188 = vmatprep.mubr.msk.bf16.mxu0 %vm864_vm2, %v837_v40 }
 0x12c   :  { %v640_v43 = vpop.f32.mrf.mxu1  ;;  %2189 = vmatmul.mubr.msk.bf16.gmra.mxu0 %vm864_vm2, %v838_v41 }
 0x12e   :  { %v2129_v45 = vpop.f32.mrf.mxu1 }
 0x12f   :  { %v840_v49 = vpack.c.bf16 %v2129_v45, %v2128_v42 }
 0x130   :  { %v643_v46 = vpop.f32.mrf.mxu1 }
 0x131   :  { %v839_v48 = vpack.c.bf16 %v643_v46, %v640_v43  ;;  %v2726_v43 = vpop.f32.mrf.mxu0 }
 0x132   :  { %v2132_v23 = vpop.f32.mrf.mxu1 }
 0x133   :  { %2192 = vmatprep.mubr.msk.bf16.mxu0 %vm864_vm2, %v839_v48 }
 0x134   :  { %v656_v52 = vpop.f32.mrf.mxu1  ;;  %2193 = vmatmul.mubr.msk.bf16.gmra.mxu0 %vm864_vm2, %v840_v49 }
 0x136   :  { %v2133_v7 = vpop.f32.mrf.mxu1 }
 0x137   :  { %v842_v12 = vpack.c.bf16 %v2133_v7, %v2132_v23  ;;  %v2728_v23 = vpop.f32.mrf.mxu0 }
 0x138   :  { %v659_v8 = vpop.f32.mrf.mxu1 }
 0x139   :  { %v841_v9 = vpack.c.bf16 %v659_v8, %v656_v52  ;;  %v2732_v8 = vpop.f32.mrf.mxu0 }
 0x13a   :  { %v2136_v13 = vpop.f32.mrf.mxu1 }
 0x13b   :  { %2196 = vmatprep.mubr.msk.bf16.mxu0 %vm864_vm2, %v841_v9 }
 0x13c   :  { %v672_v14 = vpop.f32.mrf.mxu1  ;;  %2197 = vmatmul.mubr.msk.bf16.gmra.mxu0 %vm864_vm2, %v842_v12 }
 0x13e   :  { %v2137_v15 = vpop.f32.mrf.mxu1 }
 0x13f   :  { %v844_v20 = vpack.c.bf16 %v2137_v15, %v2136_v13  ;;  %v2734_v15 = vpop.f32.mrf.mxu0 }
 0x140   :  { %v675_v16 = vpop.f32.mrf.mxu1 }
 0x141   :  { %v843_v18 = vpack.c.bf16 %v675_v16, %v672_v14 }
 0x142   :  { %v2140_v21 = vpop.f32.mrf.mxu1 }
 0x143   :  { %2200 = vmatprep.mubr.msk.bf16.mxu0 %vm864_vm2, %v843_v18 }
 0x144   :  { %v688_v22 = vpop.f32.mrf.mxu1  ;;  %2201 = vmatmul.mubr.msk.bf16.gmra.mxu0 %vm864_vm2, %v844_v20  ;;  %v2738_v20 = vpop.f32.mrf.mxu0 }
 0x146   :  { %v2141_v24 = vpop.f32.mrf.mxu1 }
 0x147   :  { %v846_v29 = vpack.c.bf16 %v2141_v24, %v2140_v21 }
 0x148   :  { %v691_v25 = vpop.f32.mrf.mxu1 }
 0x149   :  { %v845_v28 = vpack.c.bf16 %v691_v25, %v688_v22 }
 0x14a   :  { %v2144_v30 = vpop.f32.mrf.mxu1 }
 0x14b   :  { %2204 = vmatprep.mubr.msk.bf16.mxu0 %vm864_vm2, %v845_v28  ;;  %v2740_v28 = vpop.f32.mrf.mxu0 }
 0x14c   :  { %v704_v31 = vpop.f32.mrf.mxu1  ;;  %2205 = vmatmul.mubr.msk.bf16.gmra.mxu0 %vm864_vm2, %v846_v29 }
 0x14e   :  { %v2145_v33 = vpop.f32.mrf.mxu1 }
 0x14f   :  { %v848_v37 = vpack.c.bf16 %v2145_v33, %v2144_v30 }
 0x150   :  { %v707_v34 = vpop.f32.mrf.mxu1 }
 0x151   :  { %v847_v36 = vpack.c.bf16 %v707_v34, %v704_v31  ;;  %v2744_v31 = vpop.f32.mrf.mxu0 }
 0x152   :  { %v2148_v40 = vpop.f32.mrf.mxu1 }
 0x153   :  { %2208 = vmatprep.mubr.msk.bf16.mxu0 %vm864_vm2, %v847_v36 }
 0x154   :  { %v720_v41 = vpop.f32.mrf.mxu1  ;;  %2209 = vmatmul.mubr.msk.bf16.gmra.mxu0 %vm864_vm2, %v848_v37 }
 0x156   :  { %v2149_v42 = vpop.f32.mrf.mxu1 }
 0x157   :  { %v850_v48 = vpack.c.bf16 %v2149_v42, %v2148_v40  ;;  %v2746_v40 = vpop.f32.mrf.mxu0 }
 0x158   :  { %v723_v45 = vpop.f32.mrf.mxu1 }
 0x159   :  { %v849_v46 = vpack.c.bf16 %v723_v45, %v720_v41  ;;  %v2750_v45 = vpop.f32.mrf.mxu0 }
 0x15a   :  { %v2152_v49 = vpop.f32.mrf.mxu1 }
 0x15b   :  { %2212 = vmatprep.mubr.msk.bf16.mxu0 %vm864_vm2, %v849_v46 }
 0x15c   :  { %v736_v52 = vpop.f32.mrf.mxu1  ;;  %2213 = vmatmul.mubr.msk.bf16.gmra.mxu0 %vm864_vm2, %v850_v48 }
 0x15e   :  { %v2153_v7 = vpop.f32.mrf.mxu1 }
 0x15f   :  { %v852_v13 = vpack.c.bf16 %v2153_v7, %v2152_v49  ;;  %v2752_v7 = vpop.f32.mrf.mxu0 }
 0x160   :  { %v739_v9 = vpop.f32.mrf.mxu1 }
 0x161   :  { %v851_v12 = vpack.c.bf16 %v739_v9, %v736_v52 }
 0x162   :  { %v2156_v14 = vpop.f32.mrf.mxu1 }
 0x163   :  { %2216 = vmatprep.mubr.msk.bf16.mxu0 %vm864_vm2, %v851_v12 }
 0x164   :  { %v752_v16 = vpop.f32.mrf.mxu1  ;;  %2217 = vmatmul.mubr.msk.bf16.gmra.mxu0 %vm864_vm2, %v852_v13  ;;  %v2756_v13 = vpop.f32.mrf.mxu0 }
 0x166   :  { %v2157_v18 = vpop.f32.mrf.mxu1 }
 0x167   :  { %v854_v24 = vpack.c.bf16 %v2157_v18, %v2156_v14 }
 0x168   :  { %v755_v21 = vpop.f32.mrf.mxu1 }
 0x169   :  { %v853_v22 = vpack.c.bf16 %v755_v21, %v752_v16 }
 0x16a   :  { %v2160_v25 = vpop.f32.mrf.mxu1 }
 0x16b   :  { %2220 = vmatprep.mubr.msk.bf16.mxu0 %vm864_vm2, %v853_v22  ;;  %v2758_v22 = vpop.f32.mrf.mxu0 }
 0x16c   :  { %v768_v29 = vpop.f32.mrf.mxu1  ;;  %2221 = vmatmul.mubr.msk.bf16.gmra.mxu0 %vm864_vm2, %v854_v24 }
 0x16e   :  { %v2161_v30 = vpop.f32.mrf.mxu1 }
 0x16f   :  { %v856_v36 = vpack.c.bf16 %v2161_v30, %v2160_v25 }
 0x170   :  { %v771_v33 = vpop.f32.mrf.mxu1 }
 0x171   :  { %v855_v34 = vpack.c.bf16 %v771_v33, %v768_v29  ;;  %v2762_v29 = vpop.f32.mrf.mxu0 }
 0x172   :  { %v2164_v37 = vpop.f32.mrf.mxu1 }
 0x173   :  { %2224 = vmatprep.mubr.msk.bf16.mxu0 %vm864_vm2, %v855_v34 }
 0x174   :  { %v784_v41 = vpop.f32.mrf.mxu1  ;;  %2225 = vmatmul.mubr.msk.bf16.gmra.mxu0 %vm864_vm2, %v856_v36  ;;  %v2764_v36 = vpop.f32.mrf.mxu0 }
 0x176   :  { %v2165_v42 = vpop.f32.mrf.mxu1 }
 0x177   :  { %v858_v49 = vpack.c.bf16 %v2165_v42, %v2164_v37  ;;  %v2768_v37 = vpop.f32.mrf.mxu0 }
 0x178   :  { %v787_v46 = vpop.f32.mrf.mxu1 }
 0x179   :  { %v857_v48 = vpack.c.bf16 %v787_v46, %v784_v41  ;;  %v2770_v41 = vpop.f32.mrf.mxu0 }
 0x17a   :  { %v2168_v52 = vpop.f32.mrf.mxu1 }
 0x17b   :  { %2228 = vmatprep.mubr.msk.bf16.mxu0 %vm864_vm2, %v857_v48  ;;  %v2772_v42 = vpop.f32.mrf.mxu0 }
 0x17c   :  { %v800_v9 = vpop.f32.mrf.mxu1  ;;  %2229 = vmatmul.mubr.msk.bf16.gmra.mxu0 %vm864_vm2, %v858_v49 }
 0x17d   :  { %v2774_v46 = vpop.f32.mrf.mxu0 }
 0x17e   :  { %v2169_v12 = vpop.f32.mrf.mxu1 }
 0x17f   :  { %v860_v18 = vpack.c.bf16 %v2169_v12, %v2168_v52  ;;  %v2776_v48 = vpop.f32.mrf.mxu0 }
 0x180   :  { %v803_v14 = vpop.f32.mrf.mxu1 }
 0x181   :  { %v859_v16 = vpack.c.bf16 %v803_v14, %v800_v9  ;;  %v2778_v49 = vpop.f32.mrf.mxu0 }
 0x182   :  { %v2172_v21 = vpop.f32.mrf.mxu1 }
 0x183   :  { %2232 = vmatprep.mubr.msk.bf16.mxu0 %vm864_vm2, %v859_v16  ;;  %v2780_v52 = vpop.f32.mrf.mxu0 }
 0x184   :  { %v816_v24 = vpop.f32.mrf.mxu1  ;;  %2233 = vmatmul.mubr.msk.bf16.gmra.mxu0 %vm864_vm2, %v860_v18 }
 0x185   :  { %v2782_v9 = vpop.f32.mrf.mxu0 }
 0x186   :  { %v2173_v25 = vpop.f32.mrf.mxu1 }
 0x187   :  { %v862_v34 = vpack.c.bf16 %v2173_v25, %v2172_v21  ;;  %v2784_v12 = vpop.f32.mrf.mxu0 }
 0x188   :  { %v819_v30 = vpop.f32.mrf.mxu1 }
 0x189   :  { %v861_v33 = vpack.c.bf16 %v819_v30, %v816_v24  ;;  %v2786_v14 = vpop.f32.mrf.mxu0 }
 0x18b   :  { %2236 = vmatprep.mubr.msk.bf16.mxu0 %vm864_vm2, %v861_v33  ;;  %v2788_v16 = vpop.f32.mrf.mxu0 }
 0x18c   :  { %2237 = vmatmul.mubr.msk.bf16.gmra.mxu0 %vm864_vm2, %v862_v34  ;;  %v2805_v34 = vld [vmem:[%s4093_s2] ss:$0 sm:$0xff] }
 0x18d   :  { %v2790_v18 = vpop.f32.mrf.mxu0  ;;  %v2811_v4 = vadd.f32 %v2726_v43, %v2805_v34  ;;  %v2815_v2 = vadd.f32 %v2805_v34, %v2728_v23  ;;  %v2821_v63 = vadd.f32 %v2732_v8, %v2805_v34  ;;  %v2836_v23 = vadd.f32 %v2805_v34, %v2734_v15 }
 0x18e   :  { %v2851_v8 = vadd.f32 %v2738_v20, %v2805_v34  ;;  %v2866_v20 = vadd.f32 %v2805_v34, %v2740_v28 }
 0x18f   :  { %v2792_v21 = vpop.f32.mrf.mxu0 }
 0x191   :  { %v2794_v24 = vpop.f32.mrf.mxu0 }
 0x193   :  { %v2796_v25 = vpop.f32.mrf.mxu0 }
 0x195   :  { %v2798_v30 = vpop.f32.mrf.mxu0 }
 0x197   :  { %v2800_v33 = vpop.f32.mrf.mxu0 }
 0x199   :  { %v2807_v6 = vpop.f32.mrf.mxu0 }
 0x1d4   :  { %v2178_v3 = vpop.f32.mrf.mxu0 }
 0x1d5   :  { %v1256_v1 = vadd.f32 %v2178_v3, %v2811_v4  ;;  %1515 = vrot.lane.b32.xlu1 %v2178_v3, %s2250_s21 }
 0x1d6   :  { %v999_v0 = vpop.f32.mrf.mxu0 }
 0x1d7   :  { %1320 = vst.msk [vmem:[%s4094_s5 + $0x10] sm:$0xff] %vm140_vm0, %v1256_v1  ;;  %v1254_v43 = vadd.f32 %v999_v0, %v2815_v2  ;;  %1511 = vrot.lane.b32.xlu0 %v999_v0, %s2250_s21 }
 0x1d8   :  { %1385 = vst.msk [vmem:[%s4094_s5 + $0x10] sm:$0xff] %vm1382_vm3, %v2811_v4  ;;  %v2179_v3 = vpop.f32.mrf.mxu0 }
 0x1d9   :  { %1318 = vst.msk [vmem:[%s4094_s5] sm:$0xff] %vm140_vm0, %v1254_v43  ;;  %v1257_v1 = vadd.f32 %v2179_v3, %v2821_v63  ;;  %1517 = vrot.lane.b32.xlu1 %v2179_v3, %s2250_s21 }
 0x1da   :  { %1383 = vst.msk [vmem:[%s4094_s5] sm:$0xff] %vm1382_vm3, %v2815_v2  ;;  %v1002_v0 = vpop.f32.mrf.mxu0 }
 0x1db   :  { %1321 = vst.msk [vmem:[%s4094_s5 + $0x18] sm:$0xff] %vm140_vm0, %v1257_v1  ;;  %v1255_v15 = vadd.f32 %v1002_v0, %v2836_v23  ;;  %1513 = vrot.lane.b32.xlu0 %v1002_v0, %s2250_s21  ;;  %v2880_v0 = vadd.f32 %v2744_v31, %v2805_v34  ;;  %v2895_v31 = vadd.f32 %v2805_v34, %v2746_v40 }
 0x1dc   :  { %1386 = vst.msk [vmem:[%s4094_s5 + $0x18] sm:$0xff] %vm1382_vm3, %v2821_v63  ;;  %v2182_v43 = vpop.f32.mrf.mxu0  ;;  %v2910_v40 = vadd.f32 %v2750_v45, %v2805_v34  ;;  %v2925_v45 = vadd.f32 %v2805_v34, %v2752_v7  ;;  %v2940_v7 = vadd.f32 %v2756_v13, %v2805_v34  ;;  %v2955_v13 = vadd.f32 %v2805_v34, %v2758_v22 }
 0x1dd   :  { %1319 = vst.msk [vmem:[%s4094_s5 + $0x8] sm:$0xff] %vm140_vm0, %v1255_v15  ;;  %v1260_v3 = vadd.f32 %v2182_v43, %v2851_v8  ;;  %v2970_v22 = vadd.f32 %v2762_v29, %v2805_v34  ;;  %v2985_v29 = vadd.f32 %v2805_v34, %v2764_v36  ;;  %v3000_v36 = vadd.f32 %v2768_v37, %v2805_v34 }
 0x1de   :  { %1384 = vst.msk [vmem:[%s4094_s5 + $0x8] sm:$0xff] %vm1382_vm3, %v2836_v23  ;;  %v1015_v1 = vpop.f32.mrf.mxu0  ;;  %v3015_v37 = vadd.f32 %v2805_v34, %v2770_v41  ;;  %v3030_v41 = vadd.f32 %v2772_v42, %v2805_v34  ;;  %v3045_v42 = vadd.f32 %v2805_v34, %v2774_v46  ;;  %v3060_v46 = vadd.f32 %v2776_v48, %v2805_v34 }
 0x1df   :  { %1324 = vst.msk [vmem:[%s4094_s5 + $0x30] sm:$0xff] %vm140_vm0, %v1260_v3  ;;  %v1258_v28 = vadd.f32 %v1015_v1, %v2866_v20  ;;  %1523 = vrot.lane.b32.xlu0 %v2182_v43, %s2250_s21  ;;  %v3075_v48 = vadd.f32 %v2805_v34, %v2778_v49  ;;  %v3090_v49 = vadd.f32 %v2780_v52, %v2805_v34 }
 0x1e0   :  { %1389 = vst.msk [vmem:[%s4094_s5 + $0x30] sm:$0xff] %vm1382_vm3, %v2851_v8  ;;  %v2183_v15 = vpop.f32.mrf.mxu0  ;;  %v3105_v52 = vadd.f32 %v2805_v34, %v2782_v9  ;;  %v3120_v9 = vadd.f32 %v2784_v12, %v2805_v34  ;;  %v3135_v12 = vadd.f32 %v2805_v34, %v2786_v14  ;;  %v3150_v14 = vadd.f32 %v2788_v16, %v2805_v34 }
 0x1e1   :  { %1322 = vst.msk [vmem:[%s4094_s5 + $0x20] sm:$0xff] %vm140_vm0, %v1258_v28  ;;  %v1261_v3 = vadd.f32 %v2183_v15, %v2880_v0  ;;  %1525 = vrot.lane.b32.xlu1 %v2183_v15, %s2250_s21  ;;  %v3165_v16 = vadd.f32 %v2805_v34, %v2790_v18  ;;  %v3180_v18 = vadd.f32 %v2792_v21, %v2805_v34 }
 0x1e2   :  { %1387 = vst.msk [vmem:[%s4094_s5 + $0x20] sm:$0xff] %vm1382_vm3, %v2866_v20  ;;  %v1018_v43 = vpop.f32.mrf.mxu0  ;;  %v3195_v21 = vadd.f32 %v2805_v34, %v2794_v24  ;;  %v3210_v24 = vadd.f32 %v2796_v25, %v2805_v34  ;;  %v3225_v25 = vadd.f32 %v2805_v34, %v2798_v30  ;;  %v3240_v30 = vadd.f32 %v2800_v33, %v2805_v34 }
 0x1e3   :  { %1325 = vst.msk [vmem:[%s4094_s5 + $0x38] sm:$0xff] %vm140_vm0, %v1261_v3  ;;  %v1259_v28 = vadd.f32 %v1018_v43, %v2895_v31  ;;  %1519 = vrot.lane.b32.xlu0 %v1015_v1, %s2250_s21  ;;  %v3255_v33 = vadd.f32 %v2805_v34, %v2807_v6  ;;  %v3270_v6 = vadd.f32 %v2644_v5, %v2805_v34 }
 0x1e4   :  { %1390 = vst.msk [vmem:[%s4094_s5 + $0x38] sm:$0xff] %vm1382_vm3, %v2880_v0  ;;  %v2186_v15 = vpop.f32.mrf.mxu0  ;;  %v3285_v5 = vadd.f32 %v2805_v34, %v2646_v10  ;;  %v3300_v10 = vadd.f32 %v2648_v11, %v2805_v34  ;;  %v3315_v11 = vadd.f32 %v2805_v34, %v2650_v17  ;;  %v3330_v17 = vadd.f32 %v2652_v19, %v2805_v34 }
 0x1e5   :  { %1323 = vst.msk [vmem:[%s4094_s5 + $0x28] sm:$0xff] %vm140_vm0, %v1259_v28  ;;  %v1264_v3 = vadd.f32 %v2186_v15, %v2910_v40  ;;  %1521 = vrot.lane.b32.xlu1 %v1018_v43, %s2250_s21  ;;  %v3345_v19 = vadd.f32 %v2805_v34, %v2654_v26  ;;  %v3360_v26 = vadd.f32 %v2656_v27, %v2805_v34 }
 0x1e6   :  { %1388 = vst.msk [vmem:[%s4094_s5 + $0x28] sm:$0xff] %vm1382_vm3, %v2895_v31  ;;  %v1031_v1 = vpop.f32.mrf.mxu0  ;;  %v3375_v27 = vadd.f32 %v2805_v34, %v2658_v32  ;;  %v3390_v32 = vadd.f32 %v2660_v35, %v2805_v34  ;;  %v3405_v35 = vadd.f32 %v2805_v34, %v2662_v38  ;;  %v3420_v38 = vadd.f32 %v2664_v39, %v2805_v34 }
 0x1e7   :  { %1328 = vst.msk [vmem:[%s4094_s5 + $0x50] sm:$0xff] %vm140_vm0, %v1264_v3  ;;  %v1262_v28 = vadd.f32 %v1031_v1, %v2925_v45  ;;  %1531 = vrot.lane.b32.xlu0 %v2186_v15, %s2250_s21  ;;  %v3435_v39 = vadd.f32 %v2805_v34, %v2666_v44  ;;  %v3450_v44 = vadd.f32 %v2668_v47, %v2805_v34 }
 0x1e8   :  { %1393 = vst.msk [vmem:[%s4094_s5 + $0x50] sm:$0xff] %vm1382_vm3, %v2910_v40  ;;  %v2187_v43 = vpop.f32.mrf.mxu0  ;;  %v3465_v47 = vadd.f32 %v2805_v34, %v2670_v50  ;;  %v3480_v50 = vadd.f32 %v2672_v51, %v2805_v34  ;;  %v3495_v51 = vadd.f32 %v2805_v34, %v2674_v53  ;;  %v3510_v53 = vadd.f32 %v2676_v54, %v2805_v34 }
 0x1e9   :  { %1326 = vst.msk [vmem:[%s4094_s5 + $0x40] sm:$0xff] %vm140_vm0, %v1262_v28  ;;  %v1265_v3 = vadd.f32 %v2187_v43, %v2940_v7  ;;  %1533 = vrot.lane.b32.xlu1 %v2187_v43, %s2250_s21  ;;  %v3525_v54 = vadd.f32 %v2805_v34, %v2678_v55  ;;  %v3540_v55 = vadd.f32 %v2680_v56, %v2805_v34 }
 0x1ea   :  { %1391 = vst.msk [vmem:[%s4094_s5 + $0x40] sm:$0xff] %vm1382_vm3, %v2925_v45  ;;  %v1034_v15 = vpop.f32.mrf.mxu0  ;;  %v3555_v56 = vadd.f32 %v2805_v34, %v2682_v57  ;;  %v3570_v57 = vadd.f32 %v2684_v58, %v2805_v34  ;;  %v3585_v58 = vadd.f32 %v2805_v34, %v2686_v59  ;;  %v3600_v59 = vadd.f32 %v2688_v60, %v2805_v34 }
 0x1eb   :  { %1329 = vst.msk [vmem:[%s4094_s5 + $0x58] sm:$0xff] %vm140_vm0, %v1265_v3  ;;  %v1263_v28 = vadd.f32 %v1034_v15, %v2955_v13  ;;  %1527 = vrot.lane.b32.xlu0 %v1031_v1, %s2250_s21  ;;  %v3615_v60 = vadd.f32 %v2805_v34, %v2690_v61  ;;  %v3630_v61 = vadd.f32 %v2692_v62, %v2805_v34 }
 0x1ec   :  { %1394 = vst.msk [vmem:[%s4094_s5 + $0x58] sm:$0xff] %vm1382_vm3, %v2940_v7  ;;  %v2190_v43 = vpop.f32.mrf.mxu0  ;;  %4108 = vst [vmem:[#allocation9_spill] sm:$0xff] %v3555_v56 }
 0x1ed   :  { %1327 = vst.msk [vmem:[%s4094_s5 + $0x48] sm:$0xff] %vm140_vm0, %v1263_v28  ;;  %v1268_v3 = vadd.f32 %v2190_v43, %v2970_v22  ;;  %1529 = vrot.lane.b32.xlu1 %v1034_v15, %s2250_s21  ;;  %4109 = vst [vmem:[#allocation10_spill] sm:$0xff] %v3570_v57 }
 0x1ee   :  { %1392 = vst.msk [vmem:[%s4094_s5 + $0x48] sm:$0xff] %vm1382_vm3, %v2955_v13  ;;  %v1047_v1 = vpop.f32.mrf.mxu0  ;;  %4110 = vst [vmem:[#allocation11_spill] sm:$0xff] %v3585_v58 }
 0x1ef   :  { %1332 = vst.msk [vmem:[%s4094_s5 + $0x70] sm:$0xff] %vm140_vm0, %v1268_v3  ;;  %v1266_v28 = vadd.f32 %v1047_v1, %v2985_v29  ;;  %1539 = vrot.lane.b32.xlu0 %v2190_v43, %s2250_s21  ;;  %4111 = vst [vmem:[#allocation12_spill] sm:$0xff] %v3600_v59 }
 0x1f0   :  { %1397 = vst.msk [vmem:[%s4094_s5 + $0x70] sm:$0xff] %vm1382_vm3, %v2970_v22  ;;  %v2191_v15 = vpop.f32.mrf.mxu0  ;;  %4112 = vst [vmem:[#allocation13_spill] sm:$0xff] %v3615_v60 }
 0x1f1   :  { %1330 = vst.msk [vmem:[%s4094_s5 + $0x60] sm:$0xff] %vm140_vm0, %v1266_v28  ;;  %v1269_v3 = vadd.f32 %v2191_v15, %v3000_v36  ;;  %1541 = vrot.lane.b32.xlu1 %v2191_v15, %s2250_s21 }
 0x1f2   :  { %1395 = vst.msk [vmem:[%s4094_s5 + $0x60] sm:$0xff] %vm1382_vm3, %v2985_v29  ;;  %v1050_v43 = vpop.f32.mrf.mxu0 }
 0x1f3   :  { %1333 = vst.msk [vmem:[%s4094_s5 + $0x78] sm:$0xff] %vm140_vm0, %v1269_v3  ;;  %v1267_v28 = vadd.f32 %v1050_v43, %v3015_v37  ;;  %1535 = vrot.lane.b32.xlu0 %v1047_v1, %s2250_s21 }
 0x1f4   :  { %1398 = vst.msk [vmem:[%s4094_s5 + $0x78] sm:$0xff] %vm1382_vm3, %v3000_v36  ;;  %v2194_v15 = vpop.f32.mrf.mxu0 }
 0x1f5   :  { %1331 = vst.msk [vmem:[%s4094_s5 + $0x68] sm:$0xff] %vm140_vm0, %v1267_v28  ;;  %v1272_v3 = vadd.f32 %v2194_v15, %v3030_v41  ;;  %1537 = vrot.lane.b32.xlu1 %v1050_v43, %s2250_s21 }
 0x1f6   :  { %1396 = vst.msk [vmem:[%s4094_s5 + $0x68] sm:$0xff] %vm1382_vm3, %v3015_v37  ;;  %v1063_v1 = vpop.f32.mrf.mxu0 }
 0x1f7   :  { %1336 = vst.msk [vmem:[%s4094_s5 + $0x90] sm:$0xff] %vm140_vm0, %v1272_v3  ;;  %v1270_v28 = vadd.f32 %v1063_v1, %v3045_v42  ;;  %1547 = vrot.lane.b32.xlu0 %v2194_v15, %s2250_s21 }
 0x1f8   :  { %1401 = vst.msk [vmem:[%s4094_s5 + $0x90] sm:$0xff] %vm1382_vm3, %v3030_v41  ;;  %v2195_v43 = vpop.f32.mrf.mxu0 }
 0x1f9   :  { %1334 = vst.msk [vmem:[%s4094_s5 + $0x80] sm:$0xff] %vm140_vm0, %v1270_v28  ;;  %v1273_v3 = vadd.f32 %v2195_v43, %v3060_v46  ;;  %1549 = vrot.lane.b32.xlu1 %v2195_v43, %s2250_s21 }
 0x1fa   :  { %1399 = vst.msk [vmem:[%s4094_s5 + $0x80] sm:$0xff] %vm1382_vm3, %v3045_v42  ;;  %v1066_v15 = vpop.f32.mrf.mxu0 }
 0x1fb   :  { %1337 = vst.msk [vmem:[%s4094_s5 + $0x98] sm:$0xff] %vm140_vm0, %v1273_v3  ;;  %v1271_v28 = vadd.f32 %v1066_v15, %v3075_v48  ;;  %1543 = vrot.lane.b32.xlu0 %v1063_v1, %s2250_s21 }
 0x1fc   :  { %1402 = vst.msk [vmem:[%s4094_s5 + $0x98] sm:$0xff] %vm1382_vm3, %v3060_v46  ;;  %v2198_v43 = vpop.f32.mrf.mxu0 }
 0x1fd   :  { %1335 = vst.msk [vmem:[%s4094_s5 + $0x88] sm:$0xff] %vm140_vm0, %v1271_v28  ;;  %v1276_v3 = vadd.f32 %v2198_v43, %v3090_v49  ;;  %1545 = vrot.lane.b32.xlu1 %v1066_v15, %s2250_s21 }
 0x1fe   :  { %1400 = vst.msk [vmem:[%s4094_s5 + $0x88] sm:$0xff] %vm1382_vm3, %v3075_v48  ;;  %v1079_v1 = vpop.f32.mrf.mxu0 }
 0x1ff   :  { %1340 = vst.msk [vmem:[%s4094_s5 + $0xb0] sm:$0xff] %vm140_vm0, %v1276_v3  ;;  %v1274_v28 = vadd.f32 %v1079_v1, %v3105_v52  ;;  %1555 = vrot.lane.b32.xlu0 %v2198_v43, %s2250_s21 }
 0x200   :  { %1405 = vst.msk [vmem:[%s4094_s5 + $0xb0] sm:$0xff] %vm1382_vm3, %v3090_v49  ;;  %v2199_v15 = vpop.f32.mrf.mxu0 }
 0x201   :  { %1338 = vst.msk [vmem:[%s4094_s5 + $0xa0] sm:$0xff] %vm140_vm0, %v1274_v28  ;;  %v1277_v3 = vadd.f32 %v2199_v15, %v3120_v9  ;;  %1557 = vrot.lane.b32.xlu1 %v2199_v15, %s2250_s21 }
 0x202   :  { %1403 = vst.msk [vmem:[%s4094_s5 + $0xa0] sm:$0xff] %vm1382_vm3, %v3105_v52  ;;  %v1082_v43 = vpop.f32.mrf.mxu0 }
 0x203   :  { %1341 = vst.msk [vmem:[%s4094_s5 + $0xb8] sm:$0xff] %vm140_vm0, %v1277_v3  ;;  %v1275_v28 = vadd.f32 %v1082_v43, %v3135_v12  ;;  %1551 = vrot.lane.b32.xlu0 %v1079_v1, %s2250_s21 }
 0x204   :  { %1406 = vst.msk [vmem:[%s4094_s5 + $0xb8] sm:$0xff] %vm1382_vm3, %v3120_v9  ;;  %v2202_v15 = vpop.f32.mrf.mxu0 }
 0x205   :  { %1339 = vst.msk [vmem:[%s4094_s5 + $0xa8] sm:$0xff] %vm140_vm0, %v1275_v28  ;;  %v1280_v3 = vadd.f32 %v2202_v15, %v3150_v14  ;;  %1553 = vrot.lane.b32.xlu1 %v1082_v43, %s2250_s21 }
 0x206   :  { %1404 = vst.msk [vmem:[%s4094_s5 + $0xa8] sm:$0xff] %vm1382_vm3, %v3135_v12  ;;  %v1095_v1 = vpop.f32.mrf.mxu0 }
 0x207   :  { %1344 = vst.msk [vmem:[%s4094_s5 + $0xd0] sm:$0xff] %vm140_vm0, %v1280_v3  ;;  %v1278_v28 = vadd.f32 %v1095_v1, %v3165_v16  ;;  %1563 = vrot.lane.b32.xlu0 %v2202_v15, %s2250_s21 }
 0x208   :  { %1409 = vst.msk [vmem:[%s4094_s5 + $0xd0] sm:$0xff] %vm1382_vm3, %v3150_v14  ;;  %v2203_v43 = vpop.f32.mrf.mxu0 }
 0x209   :  { %1342 = vst.msk [vmem:[%s4094_s5 + $0xc0] sm:$0xff] %vm140_vm0, %v1278_v28  ;;  %v1281_v3 = vadd.f32 %v2203_v43, %v3180_v18  ;;  %1565 = vrot.lane.b32.xlu1 %v2203_v43, %s2250_s21 }
 0x20a   :  { %1407 = vst.msk [vmem:[%s4094_s5 + $0xc0] sm:$0xff] %vm1382_vm3, %v3165_v16  ;;  %v1098_v15 = vpop.f32.mrf.mxu0 }
 0x20b   :  { %1345 = vst.msk [vmem:[%s4094_s5 + $0xd8] sm:$0xff] %vm140_vm0, %v1281_v3  ;;  %v1279_v28 = vadd.f32 %v1098_v15, %v3195_v21  ;;  %1559 = vrot.lane.b32.xlu0 %v1095_v1, %s2250_s21 }
 0x20c   :  { %1410 = vst.msk [vmem:[%s4094_s5 + $0xd8] sm:$0xff] %vm1382_vm3, %v3180_v18  ;;  %v2206_v43 = vpop.f32.mrf.mxu0 }
 0x20d   :  { %1343 = vst.msk [vmem:[%s4094_s5 + $0xc8] sm:$0xff] %vm140_vm0, %v1279_v28  ;;  %v1284_v3 = vadd.f32 %v2206_v43, %v3210_v24  ;;  %1561 = vrot.lane.b32.xlu1 %v1098_v15, %s2250_s21 }
 0x20e   :  { %1408 = vst.msk [vmem:[%s4094_s5 + $0xc8] sm:$0xff] %vm1382_vm3, %v3195_v21  ;;  %v1111_v1 = vpop.f32.mrf.mxu0 }
 0x20f   :  { %1348 = vst.msk [vmem:[%s4094_s5 + $0xf0] sm:$0xff] %vm140_vm0, %v1284_v3  ;;  %v1282_v28 = vadd.f32 %v1111_v1, %v3225_v25  ;;  %1571 = vrot.lane.b32.xlu0 %v2206_v43, %s2250_s21 }
 0x210   :  { %1413 = vst.msk [vmem:[%s4094_s5 + $0xf0] sm:$0xff] %vm1382_vm3, %v3210_v24  ;;  %v2207_v15 = vpop.f32.mrf.mxu0 }
 0x211   :  { %1346 = vst.msk [vmem:[%s4094_s5 + $0xe0] sm:$0xff] %vm140_vm0, %v1282_v28  ;;  %v1285_v3 = vadd.f32 %v2207_v15, %v3240_v30  ;;  %1573 = vrot.lane.b32.xlu1 %v2207_v15, %s2250_s21 }
 0x212   :  { %1411 = vst.msk [vmem:[%s4094_s5 + $0xe0] sm:$0xff] %vm1382_vm3, %v3225_v25  ;;  %v1114_v43 = vpop.f32.mrf.mxu0 }
 0x213   :  { %1349 = vst.msk [vmem:[%s4094_s5 + $0xf8] sm:$0xff] %vm140_vm0, %v1285_v3  ;;  %v1283_v28 = vadd.f32 %v1114_v43, %v3255_v33  ;;  %1567 = vrot.lane.b32.xlu0 %v1111_v1, %s2250_s21 }
 0x214   :  { %1414 = vst.msk [vmem:[%s4094_s5 + $0xf8] sm:$0xff] %vm1382_vm3, %v3240_v30  ;;  %v2210_v15 = vpop.f32.mrf.mxu0 }
 0x215   :  { %1347 = vst.msk [vmem:[%s4094_s5 + $0xe8] sm:$0xff] %vm140_vm0, %v1283_v28  ;;  %v1288_v3 = vadd.f32 %v2210_v15, %v3270_v6  ;;  %1569 = vrot.lane.b32.xlu1 %v1114_v43, %s2250_s21 }
 0x216   :  { %1412 = vst.msk [vmem:[%s4094_s5 + $0xe8] sm:$0xff] %vm1382_vm3, %v3255_v33  ;;  %v1127_v1 = vpop.f32.mrf.mxu0 }
 0x217   :  { %1352 = vst.msk [vmem:[%s4094_s5 + $0x110] sm:$0xff] %vm140_vm0, %v1288_v3  ;;  %v1286_v28 = vadd.f32 %v1127_v1, %v3285_v5  ;;  %1579 = vrot.lane.b32.xlu0 %v2210_v15, %s2250_s21 }
 0x218   :  { %1417 = vst.msk [vmem:[%s4094_s5 + $0x110] sm:$0xff] %vm1382_vm3, %v3270_v6  ;;  %v2211_v43 = vpop.f32.mrf.mxu0 }
 0x219   :  { %1350 = vst.msk [vmem:[%s4094_s5 + $0x100] sm:$0xff] %vm140_vm0, %v1286_v28  ;;  %v1289_v3 = vadd.f32 %v2211_v43, %v3300_v10  ;;  %1581 = vrot.lane.b32.xlu1 %v2211_v43, %s2250_s21 }
 0x21a   :  { %1415 = vst.msk [vmem:[%s4094_s5 + $0x100] sm:$0xff] %vm1382_vm3, %v3285_v5  ;;  %v1130_v15 = vpop.f32.mrf.mxu0 }
 0x21b   :  { %1353 = vst.msk [vmem:[%s4094_s5 + $0x118] sm:$0xff] %vm140_vm0, %v1289_v3  ;;  %v1287_v28 = vadd.f32 %v1130_v15, %v3315_v11  ;;  %1575 = vrot.lane.b32.xlu0 %v1127_v1, %s2250_s21 }
 0x21c   :  { %1418 = vst.msk [vmem:[%s4094_s5 + $0x118] sm:$0xff] %vm1382_vm3, %v3300_v10  ;;  %v2214_v43 = vpop.f32.mrf.mxu0 }
 0x21d   :  { %1351 = vst.msk [vmem:[%s4094_s5 + $0x108] sm:$0xff] %vm140_vm0, %v1287_v28  ;;  %v1292_v3 = vadd.f32 %v2214_v43, %v3330_v17  ;;  %1577 = vrot.lane.b32.xlu1 %v1130_v15, %s2250_s21 }
 0x21e   :  { %1416 = vst.msk [vmem:[%s4094_s5 + $0x108] sm:$0xff] %vm1382_vm3, %v3315_v11  ;;  %v1143_v1 = vpop.f32.mrf.mxu0 }
 0x21f   :  { %1356 = vst.msk [vmem:[%s4094_s5 + $0x130] sm:$0xff] %vm140_vm0, %v1292_v3  ;;  %v1290_v28 = vadd.f32 %v1143_v1, %v3345_v19  ;;  %1587 = vrot.lane.b32.xlu0 %v2214_v43, %s2250_s21 }
 0x220   :  { %1421 = vst.msk [vmem:[%s4094_s5 + $0x130] sm:$0xff] %vm1382_vm3, %v3330_v17  ;;  %v2215_v15 = vpop.f32.mrf.mxu0 }
 0x221   :  { %1354 = vst.msk [vmem:[%s4094_s5 + $0x120] sm:$0xff] %vm140_vm0, %v1290_v28  ;;  %v1293_v3 = vadd.f32 %v2215_v15, %v3360_v26  ;;  %1589 = vrot.lane.b32.xlu1 %v2215_v15, %s2250_s21 }
 0x222   :  { %1419 = vst.msk [vmem:[%s4094_s5 + $0x120] sm:$0xff] %vm1382_vm3, %v3345_v19  ;;  %v1146_v43 = vpop.f32.mrf.mxu0 }
 0x223   :  { %1357 = vst.msk [vmem:[%s4094_s5 + $0x138] sm:$0xff] %vm140_vm0, %v1293_v3  ;;  %v1291_v28 = vadd.f32 %v1146_v43, %v3375_v27  ;;  %1583 = vrot.lane.b32.xlu0 %v1143_v1, %s2250_s21 }
 0x224   :  { %1422 = vst.msk [vmem:[%s4094_s5 + $0x138] sm:$0xff] %vm1382_vm3, %v3360_v26  ;;  %v2218_v15 = vpop.f32.mrf.mxu0 }
 0x225   :  { %1355 = vst.msk [vmem:[%s4094_s5 + $0x128] sm:$0xff] %vm140_vm0, %v1291_v28  ;;  %v1296_v3 = vadd.f32 %v2218_v15, %v3390_v32  ;;  %1585 = vrot.lane.b32.xlu1 %v1146_v43, %s2250_s21 }
 0x226   :  { %1420 = vst.msk [vmem:[%s4094_s5 + $0x128] sm:$0xff] %vm1382_vm3, %v3375_v27  ;;  %v1159_v1 = vpop.f32.mrf.mxu0 }
 0x227   :  { %1360 = vst.msk [vmem:[%s4094_s5 + $0x150] sm:$0xff] %vm140_vm0, %v1296_v3  ;;  %v1294_v28 = vadd.f32 %v1159_v1, %v3405_v35  ;;  %1595 = vrot.lane.b32.xlu0 %v2218_v15, %s2250_s21 }
 0x228   :  { %1425 = vst.msk [vmem:[%s4094_s5 + $0x150] sm:$0xff] %vm1382_vm3, %v3390_v32  ;;  %v2219_v43 = vpop.f32.mrf.mxu0 }
 0x229   :  { %1358 = vst.msk [vmem:[%s4094_s5 + $0x140] sm:$0xff] %vm140_vm0, %v1294_v28  ;;  %v1297_v3 = vadd.f32 %v2219_v43, %v3420_v38  ;;  %1597 = vrot.lane.b32.xlu1 %v2219_v43, %s2250_s21 }
 0x22a   :  { %1423 = vst.msk [vmem:[%s4094_s5 + $0x140] sm:$0xff] %vm1382_vm3, %v3405_v35  ;;  %v1162_v15 = vpop.f32.mrf.mxu0 }
 0x22b   :  { %1361 = vst.msk [vmem:[%s4094_s5 + $0x158] sm:$0xff] %vm140_vm0, %v1297_v3  ;;  %v1295_v28 = vadd.f32 %v1162_v15, %v3435_v39  ;;  %1591 = vrot.lane.b32.xlu0 %v1159_v1, %s2250_s21 }
 0x22c   :  { %1426 = vst.msk [vmem:[%s4094_s5 + $0x158] sm:$0xff] %vm1382_vm3, %v3420_v38  ;;  %v2222_v43 = vpop.f32.mrf.mxu0 }
 0x22d   :  { %1359 = vst.msk [vmem:[%s4094_s5 + $0x148] sm:$0xff] %vm140_vm0, %v1295_v28  ;;  %v1300_v3 = vadd.f32 %v2222_v43, %v3450_v44  ;;  %1593 = vrot.lane.b32.xlu1 %v1162_v15, %s2250_s21 }
 0x22e   :  { %1424 = vst.msk [vmem:[%s4094_s5 + $0x148] sm:$0xff] %vm1382_vm3, %v3435_v39  ;;  %v1175_v1 = vpop.f32.mrf.mxu0 }
 0x22f   :  { %1364 = vst.msk [vmem:[%s4094_s5 + $0x170] sm:$0xff] %vm140_vm0, %v1300_v3  ;;  %v1298_v28 = vadd.f32 %v1175_v1, %v3465_v47  ;;  %1603 = vrot.lane.b32.xlu0 %v2222_v43, %s2250_s21 }
 0x230   :  { %1429 = vst.msk [vmem:[%s4094_s5 + $0x170] sm:$0xff] %vm1382_vm3, %v3450_v44  ;;  %v2223_v15 = vpop.f32.mrf.mxu0 }
 0x231   :  { %1362 = vst.msk [vmem:[%s4094_s5 + $0x160] sm:$0xff] %vm140_vm0, %v1298_v28  ;;  %v1301_v3 = vadd.f32 %v2223_v15, %v3480_v50  ;;  %1605 = vrot.lane.b32.xlu1 %v2223_v15, %s2250_s21 }
 0x232   :  { %1427 = vst.msk [vmem:[%s4094_s5 + $0x160] sm:$0xff] %vm1382_vm3, %v3465_v47  ;;  %v1178_v43 = vpop.f32.mrf.mxu0 }
 0x233   :  { %1365 = vst.msk [vmem:[%s4094_s5 + $0x178] sm:$0xff] %vm140_vm0, %v1301_v3  ;;  %v1299_v28 = vadd.f32 %v1178_v43, %v3495_v51  ;;  %1599 = vrot.lane.b32.xlu0 %v1175_v1, %s2250_s21 }
 0x234   :  { %1430 = vst.msk [vmem:[%s4094_s5 + $0x178] sm:$0xff] %vm1382_vm3, %v3480_v50  ;;  %v2226_v15 = vpop.f32.mrf.mxu0 }
 0x235   :  { %1363 = vst.msk [vmem:[%s4094_s5 + $0x168] sm:$0xff] %vm140_vm0, %v1299_v28  ;;  %v1304_v3 = vadd.f32 %v2226_v15, %v3510_v53  ;;  %1601 = vrot.lane.b32.xlu1 %v1178_v43, %s2250_s21 }
 0x236   :  { %1428 = vst.msk [vmem:[%s4094_s5 + $0x168] sm:$0xff] %vm1382_vm3, %v3495_v51  ;;  %v1191_v1 = vpop.f32.mrf.mxu0 }
 0x237   :  { %1368 = vst.msk [vmem:[%s4094_s5 + $0x190] sm:$0xff] %vm140_vm0, %v1304_v3  ;;  %v1302_v28 = vadd.f32 %v1191_v1, %v3525_v54  ;;  %1611 = vrot.lane.b32.xlu0 %v2226_v15, %s2250_s21 }
 0x238   :  { %1433 = vst.msk [vmem:[%s4094_s5 + $0x190] sm:$0xff] %vm1382_vm3, %v3510_v53  ;;  %v2227_v43 = vpop.f32.mrf.mxu0 }
 0x239   :  { %1366 = vst.msk [vmem:[%s4094_s5 + $0x180] sm:$0xff] %vm140_vm0, %v1302_v28  ;;  %v1305_v3 = vadd.f32 %v2227_v43, %v3540_v55  ;;  %1613 = vrot.lane.b32.xlu1 %v2227_v43, %s2250_s21 }
 0x23a   :  { %1431 = vst.msk [vmem:[%s4094_s5 + $0x180] sm:$0xff] %vm1382_vm3, %v3525_v54  ;;  %v1194_v15 = vpop.f32.mrf.mxu0 }
 0x23b   :  { %1369 = vst.msk [vmem:[%s4094_s5 + $0x198] sm:$0xff] %vm140_vm0, %v1305_v3  ;;  %v1303_v28 = vadd.f32 %v1194_v15, %v3555_v56  ;;  %1607 = vrot.lane.b32.xlu0 %v1191_v1, %s2250_s21 }
 0x23c   :  { %1434 = vst.msk [vmem:[%s4094_s5 + $0x198] sm:$0xff] %vm1382_vm3, %v3540_v55  ;;  %v2230_v43 = vpop.f32.mrf.mxu0 }
 0x23d   :  { %1367 = vst.msk [vmem:[%s4094_s5 + $0x188] sm:$0xff] %vm140_vm0, %v1303_v28  ;;  %v1308_v3 = vadd.f32 %v2230_v43, %v3570_v57  ;;  %1609 = vrot.lane.b32.xlu1 %v1194_v15, %s2250_s21 }
 0x23e   :  { %1432 = vst.msk [vmem:[%s4094_s5 + $0x188] sm:$0xff] %vm1382_vm3, %v3555_v56  ;;  %v1207_v1 = vpop.f32.mrf.mxu0 }
 0x23f   :  { %1372 = vst.msk [vmem:[%s4094_s5 + $0x1b0] sm:$0xff] %vm140_vm0, %v1308_v3  ;;  %v1306_v28 = vadd.f32 %v1207_v1, %v3585_v58  ;;  %1619 = vrot.lane.b32.xlu0 %v2230_v43, %s2250_s21 }
 0x240   :  { %1437 = vst.msk [vmem:[%s4094_s5 + $0x1b0] sm:$0xff] %vm1382_vm3, %v3570_v57  ;;  %v2231_v15 = vpop.f32.mrf.mxu0  ;;  %v4116_v57 = vld [vmem:[#allocation4_spill] sm:$0xff] }
 0x241   :  { %1370 = vst.msk [vmem:[%s4094_s5 + $0x1a0] sm:$0xff] %vm140_vm0, %v1306_v28  ;;  %v1309_v3 = vadd.f32 %v2231_v15, %v3600_v59  ;;  %1621 = vrot.lane.b32.xlu1 %v2231_v15, %s2250_s21  ;;  %v3676_v56 = vadd.f32 %v2805_v34, %v4116_v57 }
 0x242   :  { %1435 = vst.msk [vmem:[%s4094_s5 + $0x1a0] sm:$0xff] %vm1382_vm3, %v3585_v58  ;;  %v1210_v43 = vpop.f32.mrf.mxu0  ;;  %v4113_v58 = vld [vmem:[#allocation2_spill] sm:$0xff] }
 0x243   :  { %1373 = vst.msk [vmem:[%s4094_s5 + $0x1b8] sm:$0xff] %vm140_vm0, %v1309_v3  ;;  %v1307_v28 = vadd.f32 %v1210_v43, %v3615_v60  ;;  %1615 = vrot.lane.b32.xlu0 %v1207_v1, %s2250_s21  ;;  %v3645_v62 = vadd.f32 %v2805_v34, %v4113_v58 }
 0x244   :  { %1438 = vst.msk [vmem:[%s4094_s5 + $0x1b8] sm:$0xff] %vm1382_vm3, %v3600_v59  ;;  %v2234_v15 = vpop.f32.mrf.mxu0  ;;  %v4115_v59 = vld [vmem:[#allocation3_spill] sm:$0xff] }
 0x245   :  { %4114 = vst [vmem:[#allocation2_spill] sm:$0xff] %v3645_v62  ;;  %1371 = vst.msk [vmem:[%s4094_s5 + $0x1a8] sm:$0xff] %vm140_vm0, %v1307_v28  ;;  %v1312_v3 = vadd.f32 %v2234_v15, %v3630_v61  ;;  %1617 = vrot.lane.b32.xlu1 %v1210_v43, %s2250_s21  ;;  %v3660_v58 = vadd.f32 %v4115_v59, %v2805_v34 }
 0x246   :  { %1436 = vst.msk [vmem:[%s4094_s5 + $0x1a8] sm:$0xff] %vm1382_vm3, %v3615_v60  ;;  %v1223_v1 = vpop.f32.mrf.mxu0 }
 0x247   :  { %1376 = vst.msk [vmem:[%s4094_s5 + $0x1d0] sm:$0xff] %vm140_vm0, %v1312_v3  ;;  %v1310_v28 = vadd.f32 %v1223_v1, %v3645_v62  ;;  %v1516_v43 = vpop.permute.xlu1 %1515  ;;  %1627 = vrot.lane.b32.xlu0 %v2234_v15, %s2250_s21 }
 0x248   :  { %1441 = vst.msk [vmem:[%s4094_s5 + $0x1d0] sm:$0xff] %vm1382_vm3, %v3630_v61  ;;  %v1705_v59 = vadd.f32 %v1516_v43, %v2811_v4  ;;  %v2235_v60 = vpop.f32.mrf.mxu0 }
 0x249   :  { %1374 = vst.msk [vmem:[%s4094_s5 + $0x1c0] sm:$0xff] %vm140_vm0, %v1310_v28  ;;  %v1313_v15 = vadd.f32 %v2235_v60, %v3660_v58  ;;  %v1512_v3 = vpop.permute.xlu0 %1511  ;;  %1629 = vrot.lane.b32.xlu1 %v2235_v60, %s2250_s21  ;;  %v4117_v28 = vld [vmem:[#allocation5_spill] sm:$0xff] }
 0x24a   :  { %1439 = vst.msk [vmem:[%s4094_s5 + $0x1c0] sm:$0xff] %vm1382_vm3, %v3645_v62  ;;  %v1703_v4 = vadd.f32 %v1512_v3, %v2815_v2  ;;  %v1226_v57 = vpop.f32.mrf.mxu0  ;;  %v3696_v43 = vadd.f32 %v4117_v28, %v2805_v34 }
 0x24b   :  { %1770 = vst.msk [vmem:[%s4094_s5 + $0x10] sm:$0xff] %vm1767_vm4, %v1705_v59  ;;  %v1311_v60 = vadd.f32 %v1226_v57, %v3676_v56  ;;  %v1518_v62 = vpop.permute.xlu1 %1517  ;;  %1623 = vrot.lane.b32.xlu0 %v1223_v1, %s2250_s21 }
 0x24c   :  { %1377 = vst.msk [vmem:[%s4094_s5 + $0x1d8] sm:$0xff] %vm140_vm0, %v1313_v15  ;;  %v1706_v2 = vadd.f32 %v1518_v62, %v2821_v63  ;;  %v2238_v59 = vpop.f32.mrf.mxu0  ;;  %v4118_v15 = vld [vmem:[#allocation6_spill] sm:$0xff] }
 0x24d   :  { %1442 = vst.msk [vmem:[%s4094_s5 + $0x1d8] sm:$0xff] %vm1382_vm3, %v3660_v58  ;;  %v3716_v3 = vadd.f32 %v2805_v34, %v4118_v15  ;;  %v1316_v1 = vadd.f32 %v2238_v59, %v3696_v43  ;;  %v1514_v28 = vpop.permute.xlu0 %1513  ;;  %1625 = vrot.lane.b32.xlu1 %v1226_v57, %s2250_s21 }
 0x24e   :  { %1768 = vst.msk [vmem:[%s4094_s5] sm:$0xff] %vm1767_vm4, %v1703_v4  ;;  %1771 = vst.msk [vmem:[%s4094_s5 + $0x18] sm:$0xff] %vm1767_vm4, %v1706_v2  ;;  %v1704_v63 = vadd.f32 %v1514_v28, %v2836_v23  ;;  %v1239_v62 = vpop.f32.mrf.mxu0  ;;  %v4119_v4 = vld [vmem:[#allocation7_spill] sm:$0xff]  ;;  %v4120_v2 = vld [vmem:[#allocation8_spill] sm:$0xff] }
 0x24f   :  { %1375 = vst.msk [vmem:[%s4094_s5 + $0x1c8] sm:$0xff] %vm140_vm0, %v1311_v60  ;;  %v3736_v60 = vadd.f32 %v4119_v4, %v2805_v34  ;;  %1380 = vst.msk [vmem:[%s4094_s5 + $0x1f0] sm:$0xff] %vm140_vm0, %v1316_v1  ;;  %v1314_v57 = vadd.f32 %v1239_v62, %v3716_v3  ;;  %1631 = vrot.lane.b32.xlu0 %v1239_v62, %s2250_s21  ;;  %v3755_v15 = vadd.f32 %v2805_v34, %v4120_v2 }
 0x250   :  { %1440 = vst.msk [vmem:[%s4094_s5 + $0x1c8] sm:$0xff] %vm1382_vm3, %v3676_v56  ;;  %1445 = vst.msk [vmem:[%s4094_s5 + $0x1f0] sm:$0xff] %vm1382_vm3, %v3696_v43  ;;  %v2239_v23 = vpop.f32.mrf.mxu0 }
 0x251   :  { %1769 = vst.msk [vmem:[%s4094_s5 + $0x8] sm:$0xff] %vm1767_vm4, %v1704_v63  ;;  %v1317_v1 = vadd.f32 %v2239_v23, %v3736_v60  ;;  %v1524_v28 = vpop.permute.xlu0 %1523 }
 0x252   :  { %1378 = vst.msk [vmem:[%s4094_s5 + $0x1e0] sm:$0xff] %vm140_vm0, %v1314_v57  ;;  %v1709_v63 = vadd.f32 %v1524_v28, %v2851_v8  ;;  %v1242_v62 = vpop.f32.mrf.mxu0 }
 0x253   :  { %1443 = vst.msk [vmem:[%s4094_s5 + $0x1e0] sm:$0xff] %vm1382_vm3, %v3716_v3  ;;  %v1315_v34 = vadd.f32 %v1242_v62, %v3755_v15  ;;  %v1526_v4 = vpop.permute.xlu1 %1525  ;;  %1635 = vrot.lane.b32.xlu0 %v2238_v59, %s2250_s21  ;;  %1633 = vrot.lane.b32.xlu1 %v1242_v62, %s2250_s21 }
 0x254   :  { %1381 = vst.msk [vmem:[%s4094_s5 + $0x1f8] sm:$0xff] %vm140_vm0, %v1317_v1  ;;  %v1710_v8 = vadd.f32 %v1526_v4, %v2880_v0 }
 0x255   :  { %1446 = vst.msk [vmem:[%s4094_s5 + $0x1f8] sm:$0xff] %vm1382_vm3, %v3736_v60  ;;  %v1520_v59 = vpop.permute.xlu0 %1519 }
 0x256   :  { %1774 = vst.msk [vmem:[%s4094_s5 + $0x30] sm:$0xff] %vm1767_vm4, %v1709_v63  ;;  %1775 = vst.msk [vmem:[%s4094_s5 + $0x38] sm:$0xff] %vm1767_vm4, %v1710_v8  ;;  %v1707_v57 = vadd.f32 %v1520_v59, %v2866_v20 }
 0x257   :  { %1379 = vst.msk [vmem:[%s4094_s5 + $0x1e8] sm:$0xff] %vm140_vm0, %v1315_v34  ;;  %v1522_v0 = vpop.permute.xlu1 %1521  ;;  %1637 = vrot.lane.b32.xlu1 %v2239_v23, %s2250_s21 }
 0x258   :  { %1444 = vst.msk [vmem:[%s4094_s5 + $0x1e8] sm:$0xff] %vm1382_vm3, %v3755_v15  ;;  %v1708_v2 = vadd.f32 %v1522_v0, %v2895_v31 }
 0x259   :  { %1772 = vst.msk [vmem:[%s4094_s5 + $0x20] sm:$0xff] %vm1767_vm4, %v1707_v57  ;;  %v1532_v1 = vpop.permute.xlu0 %1531 }
 0x25a   :  { %1773 = vst.msk [vmem:[%s4094_s5 + $0x28] sm:$0xff] %vm1767_vm4, %v1708_v2  ;;  %v1713_v28 = vadd.f32 %v1532_v1, %v2910_v40 }
 0x25b   :  { %v1534_v63 = vpop.permute.xlu1 %1533 }
 0x25c   :  { %1778 = vst.msk [vmem:[%s4094_s5 + $0x50] sm:$0xff] %vm1767_vm4, %v1713_v28  ;;  %v1714_v20 = vadd.f32 %v1534_v63, %v2940_v7 }
 0x25d   :  { %v1528_v23 = vpop.permute.xlu0 %1527 }
 0x25e   :  { %1779 = vst.msk [vmem:[%s4094_s5 + $0x58] sm:$0xff] %vm1767_vm4, %v1714_v20  ;;  %v1711_v31 = vadd.f32 %v1528_v23, %v2925_v45 }
 0x25f   :  { %v1530_v62 = vpop.permute.xlu1 %1529 }
 0x260   :  { %1776 = vst.msk [vmem:[%s4094_s5 + $0x40] sm:$0xff] %vm1767_vm4, %v1711_v31  ;;  %v1712_v40 = vadd.f32 %v1530_v62, %v2955_v13 }
 0x261   :  { %v1540_v34 = vpop.permute.xlu0 %1539 }
 0x262   :  { %1777 = vst.msk [vmem:[%s4094_s5 + $0x48] sm:$0xff] %vm1767_vm4, %v1712_v40  ;;  %v1717_v7 = vadd.f32 %v1540_v34, %v2970_v22 }
 0x263   :  { %v1542_v4 = vpop.permute.xlu1 %1541 }
 0x264   :  { %1782 = vst.msk [vmem:[%s4094_s5 + $0x70] sm:$0xff] %vm1767_vm4, %v1717_v7  ;;  %v1718_v45 = vadd.f32 %v1542_v4, %v3000_v36 }
 0x265   :  { %v1536_v8 = vpop.permute.xlu0 %1535 }
 0x266   :  { %1783 = vst.msk [vmem:[%s4094_s5 + $0x78] sm:$0xff] %vm1767_vm4, %v1718_v45  ;;  %v1715_v13 = vadd.f32 %v1536_v8, %v2985_v29 }
 0x267   :  { %v1538_v59 = vpop.permute.xlu1 %1537 }
 0x268   :  { %1780 = vst.msk [vmem:[%s4094_s5 + $0x60] sm:$0xff] %vm1767_vm4, %v1715_v13  ;;  %v1716_v22 = vadd.f32 %v1538_v59, %v3015_v37 }
 0x269   :  { %v1548_v57 = vpop.permute.xlu0 %1547 }
 0x26a   :  { %1781 = vst.msk [vmem:[%s4094_s5 + $0x68] sm:$0xff] %vm1767_vm4, %v1716_v22  ;;  %v1721_v36 = vadd.f32 %v1548_v57, %v3030_v41 }
 0x26b   :  { %v1550_v0 = vpop.permute.xlu1 %1549 }
 0x26c   :  { %1786 = vst.msk [vmem:[%s4094_s5 + $0x90] sm:$0xff] %vm1767_vm4, %v1721_v36  ;;  %v1722_v29 = vadd.f32 %v1550_v0, %v3060_v46 }
 0x26d   :  { %v1544_v2 = vpop.permute.xlu0 %1543 }
 0x26e   :  { %1787 = vst.msk [vmem:[%s4094_s5 + $0x98] sm:$0xff] %vm1767_vm4, %v1722_v29  ;;  %v1719_v37 = vadd.f32 %v1544_v2, %v3045_v42 }
 0x26f   :  { %v1546_v1 = vpop.permute.xlu1 %1545 }
 0x270   :  { %1784 = vst.msk [vmem:[%s4094_s5 + $0x80] sm:$0xff] %vm1767_vm4, %v1719_v37  ;;  %v1720_v41 = vadd.f32 %v1546_v1, %v3075_v48 }
 0x271   :  { %v1556_v28 = vpop.permute.xlu0 %1555 }
 0x272   :  { %1785 = vst.msk [vmem:[%s4094_s5 + $0x88] sm:$0xff] %vm1767_vm4, %v1720_v41  ;;  %v1725_v46 = vadd.f32 %v1556_v28, %v3090_v49 }
 0x273   :  { %v1558_v63 = vpop.permute.xlu1 %1557 }
 0x274   :  { %1790 = vst.msk [vmem:[%s4094_s5 + $0xb0] sm:$0xff] %vm1767_vm4, %v1725_v46  ;;  %v1726_v42 = vadd.f32 %v1558_v63, %v3120_v9 }
 0x275   :  { %v1552_v20 = vpop.permute.xlu0 %1551 }
 0x276   :  { %1791 = vst.msk [vmem:[%s4094_s5 + $0xb8] sm:$0xff] %vm1767_vm4, %v1726_v42  ;;  %v1723_v48 = vadd.f32 %v1552_v20, %v3105_v52 }
 0x277   :  { %v1554_v23 = vpop.permute.xlu1 %1553 }
 0x278   :  { %1788 = vst.msk [vmem:[%s4094_s5 + $0xa0] sm:$0xff] %vm1767_vm4, %v1723_v48  ;;  %v1724_v49 = vadd.f32 %v1554_v23, %v3135_v12 }
 0x279   :  { %v1564_v31 = vpop.permute.xlu0 %1563 }
 0x27a   :  { %1789 = vst.msk [vmem:[%s4094_s5 + $0xa8] sm:$0xff] %vm1767_vm4, %v1724_v49  ;;  %v1729_v9 = vadd.f32 %v1564_v31, %v3150_v14 }
 0x27b   :  { %v1566_v62 = vpop.permute.xlu1 %1565 }
 0x27c   :  { %1794 = vst.msk [vmem:[%s4094_s5 + $0xd0] sm:$0xff] %vm1767_vm4, %v1729_v9  ;;  %v1730_v52 = vadd.f32 %v1566_v62, %v3180_v18 }
 0x27d   :  { %v1560_v40 = vpop.permute.xlu0 %1559 }
 0x27e   :  { %1795 = vst.msk [vmem:[%s4094_s5 + $0xd8] sm:$0xff] %vm1767_vm4, %v1730_v52  ;;  %v1727_v12 = vadd.f32 %v1560_v40, %v3165_v16 }
 0x27f   :  { %v1562_v34 = vpop.permute.xlu1 %1561 }
 0x280   :  { %1792 = vst.msk [vmem:[%s4094_s5 + $0xc0] sm:$0xff] %vm1767_vm4, %v1727_v12  ;;  %v1728_v14 = vadd.f32 %v1562_v34, %v3195_v21 }
 0x281   :  { %v1572_v7 = vpop.permute.xlu0 %1571 }
 0x282   :  { %1793 = vst.msk [vmem:[%s4094_s5 + $0xc8] sm:$0xff] %vm1767_vm4, %v1728_v14  ;;  %v1733_v18 = vadd.f32 %v1572_v7, %v3210_v24  ;;  %v4124_v14 = vld [vmem:[#allocation11_spill] sm:$0xff] }
 0x283   :  { %v1574_v4 = vpop.permute.xlu1 %1573 }
 0x284   :  { %1798 = vst.msk [vmem:[%s4094_s5 + $0xf0] sm:$0xff] %vm1767_vm4, %v1733_v18  ;;  %v1734_v16 = vadd.f32 %v1574_v4, %v3240_v30  ;;  %v4125_v4 = vld [vmem:[#allocation13_spill] sm:$0xff] }
 0x285   :  { %v1568_v45 = vpop.permute.xlu0 %1567 }
 0x286   :  { %1799 = vst.msk [vmem:[%s4094_s5 + $0xf8] sm:$0xff] %vm1767_vm4, %v1734_v16  ;;  %v1731_v21 = vadd.f32 %v1568_v45, %v3225_v25 }
 0x287   :  { %v1570_v8 = vpop.permute.xlu1 %1569 }
 0x288   :  { %1796 = vst.msk [vmem:[%s4094_s5 + $0xe0] sm:$0xff] %vm1767_vm4, %v1731_v21  ;;  %v1732_v24 = vadd.f32 %v1570_v8, %v3255_v33 }
 0x289   :  { %v1580_v13 = vpop.permute.xlu0 %1579 }
 0x28a   :  { %1797 = vst.msk [vmem:[%s4094_s5 + $0xe8] sm:$0xff] %vm1767_vm4, %v1732_v24  ;;  %v1737_v30 = vadd.f32 %v1580_v13, %v3270_v6 }
 0x28b   :  { %v1582_v59 = vpop.permute.xlu1 %1581 }
 0x28c   :  { %1802 = vst.msk [vmem:[%s4094_s5 + $0x110] sm:$0xff] %vm1767_vm4, %v1737_v30  ;;  %v1738_v25 = vadd.f32 %v1582_v59, %v3300_v10  ;;  %v4126_v30 = vld [vmem:[#allocation2_spill] sm:$0xff] }
 0x28d   :  { %v1576_v22 = vpop.permute.xlu0 %1575 }
 0x28e   :  { %1803 = vst.msk [vmem:[%s4094_s5 + $0x118] sm:$0xff] %vm1767_vm4, %v1738_v25  ;;  %v1735_v33 = vadd.f32 %v1576_v22, %v3285_v5 }
 0x28f   :  { %v1578_v57 = vpop.permute.xlu1 %1577 }
 0x290   :  { %1800 = vst.msk [vmem:[%s4094_s5 + $0x100] sm:$0xff] %vm1767_vm4, %v1735_v33  ;;  %v1736_v6 = vadd.f32 %v1578_v57, %v3315_v11 }
 0x291   :  { %v1588_v36 = vpop.permute.xlu0 %1587 }
 0x292   :  { %1801 = vst.msk [vmem:[%s4094_s5 + $0x108] sm:$0xff] %vm1767_vm4, %v1736_v6  ;;  %v1741_v10 = vadd.f32 %v1588_v36, %v3330_v17 }
 0x293   :  { %v1590_v0 = vpop.permute.xlu1 %1589 }
 0x294   :  { %1806 = vst.msk [vmem:[%s4094_s5 + $0x130] sm:$0xff] %vm1767_vm4, %v1741_v10  ;;  %v1742_v5 = vadd.f32 %v1590_v0, %v3360_v26 }
 0x295   :  { %v1584_v29 = vpop.permute.xlu0 %1583 }
 0x296   :  { %1807 = vst.msk [vmem:[%s4094_s5 + $0x138] sm:$0xff] %vm1767_vm4, %v1742_v5  ;;  %v1739_v11 = vadd.f32 %v1584_v29, %v3345_v19 }
 0x297   :  { %v1586_v2 = vpop.permute.xlu1 %1585 }
 0x298   :  { %1804 = vst.msk [vmem:[%s4094_s5 + $0x120] sm:$0xff] %vm1767_vm4, %v1739_v11  ;;  %v1740_v17 = vadd.f32 %v1586_v2, %v3375_v27 }
 0x299   :  { %v1596_v37 = vpop.permute.xlu0 %1595 }
 0x29a   :  { %1805 = vst.msk [vmem:[%s4094_s5 + $0x128] sm:$0xff] %vm1767_vm4, %v1740_v17  ;;  %v1745_v26 = vadd.f32 %v1596_v37, %v3390_v32 }
 0x29b   :  { %v1598_v1 = vpop.permute.xlu1 %1597 }
 0x29c   :  { %1810 = vst.msk [vmem:[%s4094_s5 + $0x150] sm:$0xff] %vm1767_vm4, %v1745_v26  ;;  %v1746_v19 = vadd.f32 %v1598_v1, %v3420_v38 }
 0x29d   :  { %v1592_v41 = vpop.permute.xlu0 %1591 }
 0x29e   :  { %1811 = vst.msk [vmem:[%s4094_s5 + $0x158] sm:$0xff] %vm1767_vm4, %v1746_v19  ;;  %v1743_v27 = vadd.f32 %v1592_v41, %v3405_v35 }
 0x29f   :  { %v1594_v28 = vpop.permute.xlu1 %1593 }
 0x2a0   :  { %1808 = vst.msk [vmem:[%s4094_s5 + $0x140] sm:$0xff] %vm1767_vm4, %v1743_v27  ;;  %v1744_v32 = vadd.f32 %v1594_v28, %v3435_v39 }
 0x2a1   :  { %v1604_v46 = vpop.permute.xlu0 %1603 }
 0x2a2   :  { %1809 = vst.msk [vmem:[%s4094_s5 + $0x148] sm:$0xff] %vm1767_vm4, %v1744_v32  ;;  %v1749_v38 = vadd.f32 %v1604_v46, %v3450_v44 }
 0x2a3   :  { %v1606_v63 = vpop.permute.xlu1 %1605 }
 0x2a4   :  { %1814 = vst.msk [vmem:[%s4094_s5 + $0x170] sm:$0xff] %vm1767_vm4, %v1749_v38  ;;  %v1750_v35 = vadd.f32 %v1606_v63, %v3480_v50 }
 0x2a5   :  { %v1600_v42 = vpop.permute.xlu0 %1599 }
 0x2a6   :  { %1815 = vst.msk [vmem:[%s4094_s5 + $0x178] sm:$0xff] %vm1767_vm4, %v1750_v35  ;;  %v1747_v39 = vadd.f32 %v1600_v42, %v3465_v47 }
 0x2a7   :  { %v1602_v20 = vpop.permute.xlu1 %1601 }
 0x2a8   :  { %1812 = vst.msk [vmem:[%s4094_s5 + $0x160] sm:$0xff] %vm1767_vm4, %v1747_v39  ;;  %v1748_v44 = vadd.f32 %v1602_v20, %v3495_v51 }
 0x2a9   :  { %v1612_v48 = vpop.permute.xlu0 %1611 }
 0x2aa   :  { %1813 = vst.msk [vmem:[%s4094_s5 + $0x168] sm:$0xff] %vm1767_vm4, %v1748_v44  ;;  %v1753_v50 = vadd.f32 %v1612_v48, %v3510_v53  ;;  %v4121_v53 = vld [vmem:[#allocation9_spill] sm:$0xff] }
 0x2ab   :  { %v1614_v23 = vpop.permute.xlu1 %1613 }
 0x2ac   :  { %1818 = vst.msk [vmem:[%s4094_s5 + $0x190] sm:$0xff] %vm1767_vm4, %v1753_v50  ;;  %v1754_v47 = vadd.f32 %v1614_v23, %v3540_v55  ;;  %v4122_v55 = vld [vmem:[#allocation10_spill] sm:$0xff] }
 0x2ad   :  { %v1608_v49 = vpop.permute.xlu0 %1607 }
 0x2ae   :  { %1819 = vst.msk [vmem:[%s4094_s5 + $0x198] sm:$0xff] %vm1767_vm4, %v1754_v47  ;;  %v1751_v51 = vadd.f32 %v1608_v49, %v3525_v54  ;;  %v4123_v54 = vld [vmem:[#allocation12_spill] sm:$0xff] }
 0x2af   :  { %v1610_v31 = vpop.permute.xlu1 %1609 }
 0x2b0   :  { %1816 = vst.msk [vmem:[%s4094_s5 + $0x180] sm:$0xff] %vm1767_vm4, %v1751_v51  ;;  %v1752_v9 = vadd.f32 %v1610_v31, %v4121_v53 }
 0x2b1   :  { %v1620_v62 = vpop.permute.xlu0 %1619 }
 0x2b2   :  { %1817 = vst.msk [vmem:[%s4094_s5 + $0x188] sm:$0xff] %vm1767_vm4, %v1752_v9  ;;  %v1757_v52 = vadd.f32 %v1620_v62, %v4122_v55 }
 0x2b3   :  { %v1622_v40 = vpop.permute.xlu1 %1621 }
 0x2b4   :  { %1822 = vst.msk [vmem:[%s4094_s5 + $0x1b0] sm:$0xff] %vm1767_vm4, %v1757_v52  ;;  %v1758_v12 = vadd.f32 %v1622_v40, %v4123_v54 }
 0x2b5   :  { %v1616_v34 = vpop.permute.xlu0 %1615 }
 0x2b6   :  { %1823 = vst.msk [vmem:[%s4094_s5 + $0x1b8] sm:$0xff] %vm1767_vm4, %v1758_v12  ;;  %v1755_v7 = vadd.f32 %v1616_v34, %v4124_v14 }
 0x2b7   :  { %v1618_v18 = vpop.permute.xlu1 %1617 }
 0x2b8   :  { %1820 = vst.msk [vmem:[%s4094_s5 + $0x1a0] sm:$0xff] %vm1767_vm4, %v1755_v7  ;;  %v1756_v16 = vadd.f32 %v1618_v18, %v4125_v4 }
 0x2b9   :  { %v1628_v45 = vpop.permute.xlu0 %1627 }
 0x2ba   :  { %1821 = vst.msk [vmem:[%s4094_s5 + $0x1a8] sm:$0xff] %vm1767_vm4, %v1756_v16  ;;  %v1761_v21 = vadd.f32 %v1628_v45, %v3630_v61 }
 0x2bb   :  { %v1630_v8 = vpop.permute.xlu1 %1629 }
 0x2bc   :  { %1826 = vst.msk [vmem:[%s4094_s5 + $0x1d0] sm:$0xff] %vm1767_vm4, %v1761_v21  ;;  %v1762_v24 = vadd.f32 %v1630_v8, %v3660_v58 }
 0x2bd   :  { %v1624_v13 = vpop.permute.xlu0 %1623 }
 0x2be   :  { %1827 = vst.msk [vmem:[%s4094_s5 + $0x1d8] sm:$0xff] %vm1767_vm4, %v1762_v24  ;;  %v1759_v59 = vadd.f32 %v1624_v13, %v4126_v30 }
 0x2bf   :  { %v1626_v25 = vpop.permute.xlu1 %1625 }
 0x2c0   :  { %1824 = vst.msk [vmem:[%s4094_s5 + $0x1c0] sm:$0xff] %vm1767_vm4, %v1759_v59  ;;  %v1760_v61 = vadd.f32 %v1626_v25, %v3676_v56 }
 0x2c1   :  { %v1632_v22 = vpop.permute.xlu0 %1631 }
 0x2c2   :  { %1825 = vst.msk [vmem:[%s4094_s5 + $0x1c8] sm:$0xff] %vm1767_vm4, %v1760_v61  ;;  %v1763_v58 = vadd.f32 %v1632_v22, %v3716_v3 }
 0x2c4   :  { %1828 = vst.msk [vmem:[%s4094_s5 + $0x1e0] sm:$0xff] %vm1767_vm4, %v1763_v58 }
 0x2c5   :  { %v1636_v33 = vpop.permute.xlu0 %1635  ;;  %v1634_v57 = vpop.permute.xlu1 %1633 }
 0x2c6   :  { %v1765_v6 = vadd.f32 %v1636_v33, %v3696_v43  ;;  %v1764_v36 = vadd.f32 %v1634_v57, %v3755_v15 }
 0x2c8   :  { %1830 = vst.msk [vmem:[%s4094_s5 + $0x1f0] sm:$0xff] %vm1767_vm4, %v1765_v6  ;;  %1829 = vst.msk [vmem:[%s4094_s5 + $0x1e8] sm:$0xff] %vm1767_vm4, %v1764_v36 }
 0x2c9   :  { %v1638_v56 = vpop.permute.xlu1 %1637 }
 0x2ca   :  { %v1766_v3 = vadd.f32 %v1638_v56, %v3736_v60 }
 0x2cc   :  { %1831 = vst.msk [vmem:[%s4094_s5 + $0x1f8] sm:$0xff] %vm1767_vm4, %v1766_v3 }

</bundles_post_ra>
